<compile_context>
chip_gen: v7x
topology: tpu7x:2x2x1
jax: 0.10.0
libtpu: 0.0.40
codegen_flags: <defaults>
</compile_context>

<pallas_src>
import jax
import jax.numpy as jnp
from jax.experimental import pallas as pl

LANE = 128


def _bdot(a, b):
    """MXU matmul: bf16 operands, f32 accumulation."""
    return jnp.dot(a.astype(jnp.bfloat16), b.astype(jnp.bfloat16),
                   preferred_element_type=jnp.float32)


# ----------------------------- fused Pallas kernel --------------------------

def _make_fused_kernel(T, B, H, L):
    """Kernel over refs: x, (wih, whh, b) * L, w_fc_pad, b_fc_pad, out."""

    def kernel(*refs):
        x_ref = refs[0]
        layer_refs = [refs[1 + 3 * l: 1 + 3 * (l + 1)] for l in range(L)]
        w_fc_ref = refs[1 + 3 * L]
        b_fc_ref = refs[2 + 3 * L]
        out_ref = refs[3 + 3 * L]

        def cell(pre_t, h, c, whh_bf):
            # pre_t already contains x_t @ wih + b; only h @ whh is serial.
            gates = pre_t + jnp.dot(h.astype(jnp.bfloat16), whh_bf,
                                    preferred_element_type=jnp.float32)
            # full-vreg transcendentals, slice afterwards (gate order i,f,g,o)
            sig = jax.nn.sigmoid(gates)
            tnh = jnp.tanh(gates)
            i_g = sig[:, 0 * H:1 * H]
            f_g = sig[:, 1 * H:2 * H]
            g_g = tnh[:, 2 * H:3 * H]
            o_g = sig[:, 3 * H:4 * H]
            c_new = f_g * c + i_g * g_g
            h_new = o_g * jnp.tanh(c_new)
            return h_new, c_new

        # ---- layer 0: hoisted input projection (bias folded in) ------------
        wih0_ref, whh0_ref, b0_ref = layer_refs[0]
        pre0 = _bdot(x_ref[...], wih0_ref[...]) + b0_ref[...]   # (T*B, 4H) f32
        whh0_bf = whh0_ref[...].astype(jnp.bfloat16)

        h = jnp.zeros((B, H), jnp.float32)
        c = jnp.zeros((B, H), jnp.float32)
        hs = []
        for t in range(T):                       # fully unrolled (T static)
            h, c = cell(pre0[t * B:(t + 1) * B, :], h, c, whh0_bf)
            hs.append(h)

        # ---- layers 1..L-1: per-step input projection (off critical path) --
        for l in range(1, L):
            wih_ref, whh_ref, b_ref = layer_refs[l]
            wih_bf = wih_ref[...].astype(jnp.bfloat16)
            whh_bf = whh_ref[...].astype(jnp.bfloat16)
            b_bcast = jnp.broadcast_to(b_ref[...], (B, 4 * H))  # hoisted once
            h = jnp.zeros((B, H), jnp.float32)
            c = jnp.zeros((B, H), jnp.float32)
            new_hs = []
            for t in range(T):
                pre_t = jnp.dot(hs[t].astype(jnp.bfloat16), wih_bf,
                                preferred_element_type=jnp.float32) + b_bcast
                h, c = cell(pre_t, h, c, whh_bf)
                new_hs.append(h)
            hs = new_hs

        # ---- final Linear on last timestep; lane-dense padded output -------
        out_ref[...] = _bdot(hs[-1], w_fc_ref[...]) + b_fc_ref[...]

    return kernel


# --------------------------------- wrapper ----------------------------------

def lstm_model_forward(x_btd, params):
    """x_btd: (B, T, I) like the PyTorch batch_first module. Returns (B, O)."""
    B, T, I = x_btd.shape
    layers = params["layers"]
    L = len(layers)
    H = layers[0][1].shape[0]
    O = params["w_fc"].shape[1]
    O_pad = LANE * pl.cdiv(O, LANE)

    # batch_first (B,T,I) -> time-major, flattened to (T*B, I) so the layer-0
    # input projection is a single big MXU matmul.
    x_flat = jnp.transpose(x_btd, (1, 0, 2)).reshape(T * B, I).astype(jnp.float32)

    # pad fc weights so the kernel's only HBM output is 128-lane dense
    w_fc_p = jnp.zeros((H, O_pad), jnp.float32).at[:, :O].set(params["w_fc"])
    b_fc_p = jnp.zeros((1, O_pad), jnp.float32).at[:, :O].set(params["b_fc"])

    args = [x_flat]
    for (wih, whh, b) in layers:
        args += [wih, whh, b]
    args += [w_fc_p, b_fc_p]

    out_pad = pl.pallas_call(
        _make_fused_kernel(T, B, H, L),
        out_shape=jax.ShapeDtypeStruct((B, O_pad), jnp.float32),
    )(*args)
    return out_pad[:, :O]


# --------------------------- deterministic params ---------------------------

def init_params(key, input_size, hidden_size, num_layers, output_size):
    k = 1.0 / jnp.sqrt(jnp.float32(hidden_size))
    layers = []
    for layer in range(num_layers):
        d_in = input_size if layer == 0 else hidden_size
        key, k1, k2, k3, k4 = jax.random.split(key, 5)
        # PyTorch weight_ih: (4H, D) -- stored transposed (D, 4H); same for hh.
        wih = jax.random.uniform(k1, (d_in, 4 * hidden_size), jnp.float32, -k, k)
        whh = jax.random.uniform(k2, (hidden_size, 4 * hidden_size), jnp.float32, -k, k)
        b_ih = jax.random.uniform(k3, (4 * hidden_size,), jnp.float32, -k, k)
        b_hh = jax.random.uniform(k4, (4 * hidden_size,), jnp.float32, -k, k)
        layers.append((wih, whh, (b_ih + b_hh)[None, :]))
    key, k5, k6 = jax.random.split(key, 3)
    w_fc = jax.random.uniform(k5, (hidden_size, output_size), jnp.float32, -k, k)
    b_fc = jax.random.uniform(k6, (1, output_size), jnp.float32, -k, k)
    return {"layers": layers, "w_fc": w_fc, "b_fc": b_fc}


# ---------------------------- pure-JAX reference ----------------------------
# Matches the kernel's precision policy: bf16 MXU operands, f32 accumulation,
# f32 gate/state math (so tolerances stay tight).

def reference_forward(x_btd, params):
    x = jnp.transpose(x_btd, (1, 0, 2)).astype(jnp.float32)  # (T, B, D)
    for (wih, whh, b) in params["layers"]:
        T, B, _ = x.shape
        H = whh.shape[0]
        h = jnp.zeros((B, H), jnp.float32)
        c = jnp.zeros((B, H), jnp.float32)
        outs = []
        for t in range(T):
            g = _bdot(x[t], wih) + _bdot(h, whh) + b
            i = jax.nn.sigmoid(g[:, 0 * H:1 * H])
            f = jax.nn.sigmoid(g[:, 1 * H:2 * H])
            gg = jnp.tanh(g[:, 2 * H:3 * H])
            o = jax.nn.sigmoid(g[:, 3 * H:4 * H])
            c = f * c + i * gg
            h = o * jnp.tanh(c)
            outs.append(h)
        x = jnp.stack(outs, axis=0)
    return _bdot(x[-1], params["w_fc"]) + params["b_fc"]


# ----------------------------------- main ------------------------------------

if __name__ == "__main__":
    B, T, I, H, L, O = 8, 8, 16, 32, 2, 2   # batch, seq, input, hidden, layers, out

    key = jax.random.PRNGKey(0)
    key, kx, kp = jax.random.split(key, 3)
    x = jax.random.normal(kx, (B, T, I), dtype=jnp.float32)
    params = init_params(kp, I, H, L, O)

    fwd = jax.jit(lstm_model_forward)
    out = jax.block_until_ready(fwd(x, params))
    ref = jax.block_until_ready(reference_forward(x, params))

    assert out.shape == (B, O)
    assert bool(jnp.all(jnp.isfinite(out)))
    assert jnp.allclose(out, ref, rtol=2e-3, atol=2e-3), (
        f"max abs err {jnp.max(jnp.abs(out - ref))}")
    print("KERNEL_OK")
</pallas_src>

<mosaic_0001>
module attributes {stable_mosaic.version = 11 : i64} {
  func.func @kernel(%arg0: memref<64x16xf32, #tpu.memory_space<vmem>>, %arg1: memref<16x128xf32, #tpu.memory_space<vmem>>, %arg2: memref<32x128xf32, #tpu.memory_space<vmem>>, %arg3: memref<1x128xf32, #tpu.memory_space<vmem>>, %arg4: memref<32x128xf32, #tpu.memory_space<vmem>>, %arg5: memref<32x128xf32, #tpu.memory_space<vmem>>, %arg6: memref<1x128xf32, #tpu.memory_space<vmem>>, %arg7: memref<32x128xf32, #tpu.memory_space<vmem>>, %arg8: memref<1x128xf32, #tpu.memory_space<vmem>>, %arg9: memref<8x128xf32, #tpu.memory_space<vmem>>) attributes {dimension_semantics = [], scalar_prefetch = 0 : i64, scratch_operands = 0 : i64, tpu.core_type = #tpu.core_type<tc>} {
    %c0 = arith.constant 0 : index
    %c0_0 = arith.constant 0 : index
    %0 = vector.load %arg0[%c0, %c0_0] : memref<64x16xf32, #tpu.memory_space<vmem>>, vector<64x16xf32>
    %c0_1 = arith.constant 0 : index
    %c0_2 = arith.constant 0 : index
    %1 = vector.load %arg1[%c0_1, %c0_2] : memref<16x128xf32, #tpu.memory_space<vmem>>, vector<16x128xf32>
    %2 = arith.truncf %0 : vector<64x16xf32> to vector<64x16xbf16>
    %3 = arith.truncf %1 : vector<16x128xf32> to vector<16x128xbf16>
    %cst = arith.constant dense<0.000000e+00> : vector<64x128xf32>
    %4 = tpu.matmul %2, %3, %cst {dimension_numbers = #tpu.dot_dimension_numbers<[1], [0], [0], [1], [0, 0, 1, 1], [], []>} : vector<64x16xbf16>, vector<16x128xbf16>, vector<64x128xf32> -> vector<64x128xf32>
    %c0_3 = arith.constant 0 : index
    %c0_4 = arith.constant 0 : index
    %5 = vector.load %arg3[%c0_3, %c0_4] : memref<1x128xf32, #tpu.memory_space<vmem>>, vector<1x128xf32>
    %6 = vector.broadcast %5 : vector<1x128xf32> to vector<64x128xf32>
    %7 = arith.addf %4, %6 : vector<64x128xf32>
    %c0_5 = arith.constant 0 : index
    %c0_6 = arith.constant 0 : index
    %8 = vector.load %arg2[%c0_5, %c0_6] : memref<32x128xf32, #tpu.memory_space<vmem>>, vector<32x128xf32>
    %9 = arith.truncf %8 : vector<32x128xf32> to vector<32x128xbf16>
    %cst_7 = arith.constant 0.000000e+00 : f32
    %10 = vector.broadcast %cst_7 : f32 to vector<8x32xf32>
    %cst_8 = arith.constant 0.000000e+00 : f32
    %11 = vector.broadcast %cst_8 : f32 to vector<8x32xf32>
    %12 = vector.extract_strided_slice %7 {offsets = [0, 0], sizes = [8, 128], strides = [1, 1]} : vector<64x128xf32> to vector<8x128xf32>
    %13 = arith.truncf %10 : vector<8x32xf32> to vector<8x32xbf16>
    %cst_9 = arith.constant dense<0.000000e+00> : vector<8x128xf32>
    %14 = tpu.matmul %13, %9, %cst_9 {dimension_numbers = #tpu.dot_dimension_numbers<[1], [0], [0], [1], [0, 0, 1, 1], [], []>} : vector<8x32xbf16>, vector<32x128xbf16>, vector<8x128xf32> -> vector<8x128xf32>
    %15 = arith.addf %12, %14 : vector<8x128xf32>
    %16 = arith.negf %15 : vector<8x128xf32>
    %17 = math.exp %16 : vector<8x128xf32>
    %cst_10 = arith.constant 1.000000e+00 : f32
    %18 = vector.broadcast %cst_10 : f32 to vector<8x128xf32>
    %19 = arith.addf %18, %17 : vector<8x128xf32>
    %20 = arith.divf %18, %19 : vector<8x128xf32>
    %21 = math.tanh %15 : vector<8x128xf32>
    %22 = vector.extract_strided_slice %20 {offsets = [0, 0], sizes = [8, 32], strides = [1, 1]} : vector<8x128xf32> to vector<8x32xf32>
    %23 = vector.extract_strided_slice %20 {offsets = [0, 32], sizes = [8, 32], strides = [1, 1]} : vector<8x128xf32> to vector<8x32xf32>
    %24 = vector.extract_strided_slice %21 {offsets = [0, 64], sizes = [8, 32], strides = [1, 1]} : vector<8x128xf32> to vector<8x32xf32>
    %25 = vector.extract_strided_slice %20 {offsets = [0, 96], sizes = [8, 32], strides = [1, 1]} : vector<8x128xf32> to vector<8x32xf32>
    %26 = arith.mulf %23, %11 : vector<8x32xf32>
    %27 = arith.mulf %22, %24 : vector<8x32xf32>
    %28 = arith.addf %26, %27 : vector<8x32xf32>
    %29 = math.tanh %28 : vector<8x32xf32>
    %30 = arith.mulf %25, %29 : vector<8x32xf32>
    %31 = vector.extract_strided_slice %7 {offsets = [8, 0], sizes = [8, 128], strides = [1, 1]} : vector<64x128xf32> to vector<8x128xf32>
    %32 = arith.truncf %30 : vector<8x32xf32> to vector<8x32xbf16>
    %cst_11 = arith.constant dense<0.000000e+00> : vector<8x128xf32>
    %33 = tpu.matmul %32, %9, %cst_11 {dimension_numbers = #tpu.dot_dimension_numbers<[1], [0], [0], [1], [0, 0, 1, 1], [], []>} : vector<8x32xbf16>, vector<32x128xbf16>, vector<8x128xf32> -> vector<8x128xf32>
    %34 = arith.addf %31, %33 : vector<8x128xf32>
    %35 = arith.negf %34 : vector<8x128xf32>
    %36 = math.exp %35 : vector<8x128xf32>
    %cst_12 = arith.constant 1.000000e+00 : f32
    %37 = vector.broadcast %cst_12 : f32 to vector<8x128xf32>
    %38 = arith.addf %37, %36 : vector<8x128xf32>
    %39 = arith.divf %37, %38 : vector<8x128xf32>
    %40 = math.tanh %34 : vector<8x128xf32>
    %41 = vector.extract_strided_slice %39 {offsets = [0, 0], sizes = [8, 32], strides = [1, 1]} : vector<8x128xf32> to vector<8x32xf32>
    %42 = vector.extract_strided_slice %39 {offsets = [0, 32], sizes = [8, 32], strides = [1, 1]} : vector<8x128xf32> to vector<8x32xf32>
    %43 = vector.extract_strided_slice %40 {offsets = [0, 64], sizes = [8, 32], strides = [1, 1]} : vector<8x128xf32> to vector<8x32xf32>
    %44 = vector.extract_strided_slice %39 {offsets = [0, 96], sizes = [8, 32], strides = [1, 1]} : vector<8x128xf32> to vector<8x32xf32>
    %45 = arith.mulf %42, %28 : vector<8x32xf32>
    %46 = arith.mulf %41, %43 : vector<8x32xf32>
    %47 = arith.addf %45, %46 : vector<8x32xf32>
    %48 = math.tanh %47 : vector<8x32xf32>
    %49 = arith.mulf %44, %48 : vector<8x32xf32>
    %50 = vector.extract_strided_slice %7 {offsets = [16, 0], sizes = [8, 128], strides = [1, 1]} : vector<64x128xf32> to vector<8x128xf32>
    %51 = arith.truncf %49 : vector<8x32xf32> to vector<8x32xbf16>
    %cst_13 = arith.constant dense<0.000000e+00> : vector<8x128xf32>
    %52 = tpu.matmul %51, %9, %cst_13 {dimension_numbers = #tpu.dot_dimension_numbers<[1], [0], [0], [1], [0, 0, 1, 1], [], []>} : vector<8x32xbf16>, vector<32x128xbf16>, vector<8x128xf32> -> vector<8x128xf32>
    %53 = arith.addf %50, %52 : vector<8x128xf32>
    %54 = arith.negf %53 : vector<8x128xf32>
    %55 = math.exp %54 : vector<8x128xf32>
    %cst_14 = arith.constant 1.000000e+00 : f32
    %56 = vector.broadcast %cst_14 : f32 to vector<8x128xf32>
    %57 = arith.addf %56, %55 : vector<8x128xf32>
    %58 = arith.divf %56, %57 : vector<8x128xf32>
    %59 = math.tanh %53 : vector<8x128xf32>
    %60 = vector.extract_strided_slice %58 {offsets = [0, 0], sizes = [8, 32], strides = [1, 1]} : vector<8x128xf32> to vector<8x32xf32>
    %61 = vector.extract_strided_slice %58 {offsets = [0, 32], sizes = [8, 32], strides = [1, 1]} : vector<8x128xf32> to vector<8x32xf32>
    %62 = vector.extract_strided_slice %59 {offsets = [0, 64], sizes = [8, 32], strides = [1, 1]} : vector<8x128xf32> to vector<8x32xf32>
    %63 = vector.extract_strided_slice %58 {offsets = [0, 96], sizes = [8, 32], strides = [1, 1]} : vector<8x128xf32> to vector<8x32xf32>
    %64 = arith.mulf %61, %47 : vector<8x32xf32>
    %65 = arith.mulf %60, %62 : vector<8x32xf32>
    %66 = arith.addf %64, %65 : vector<8x32xf32>
    %67 = math.tanh %66 : vector<8x32xf32>
    %68 = arith.mulf %63, %67 : vector<8x32xf32>
    %69 = vector.extract_strided_slice %7 {offsets = [24, 0], sizes = [8, 128], strides = [1, 1]} : vector<64x128xf32> to vector<8x128xf32>
    %70 = arith.truncf %68 : vector<8x32xf32> to vector<8x32xbf16>
    %cst_15 = arith.constant dense<0.000000e+00> : vector<8x128xf32>
    %71 = tpu.matmul %70, %9, %cst_15 {dimension_numbers = #tpu.dot_dimension_numbers<[1], [0], [0], [1], [0, 0, 1, 1], [], []>} : vector<8x32xbf16>, vector<32x128xbf16>, vector<8x128xf32> -> vector<8x128xf32>
    %72 = arith.addf %69, %71 : vector<8x128xf32>
    %73 = arith.negf %72 : vector<8x128xf32>
    %74 = math.exp %73 : vector<8x128xf32>
    %cst_16 = arith.constant 1.000000e+00 : f32
    %75 = vector.broadcast %cst_16 : f32 to vector<8x128xf32>
    %76 = arith.addf %75, %74 : vector<8x128xf32>
    %77 = arith.divf %75, %76 : vector<8x128xf32>
    %78 = math.tanh %72 : vector<8x128xf32>
    %79 = vector.extract_strided_slice %77 {offsets = [0, 0], sizes = [8, 32], strides = [1, 1]} : vector<8x128xf32> to vector<8x32xf32>
    %80 = vector.extract_strided_slice %77 {offsets = [0, 32], sizes = [8, 32], strides = [1, 1]} : vector<8x128xf32> to vector<8x32xf32>
    %81 = vector.extract_strided_slice %78 {offsets = [0, 64], sizes = [8, 32], strides = [1, 1]} : vector<8x128xf32> to vector<8x32xf32>
    %82 = vector.extract_strided_slice %77 {offsets = [0, 96], sizes = [8, 32], strides = [1, 1]} : vector<8x128xf32> to vector<8x32xf32>
    %83 = arith.mulf %80, %66 : vector<8x32xf32>
    %84 = arith.mulf %79, %81 : vector<8x32xf32>
    %85 = arith.addf %83, %84 : vector<8x32xf32>
    %86 = math.tanh %85 : vector<8x32xf32>
    %87 = arith.mulf %82, %86 : vector<8x32xf32>
    %88 = vector.extract_strided_slice %7 {offsets = [32, 0], sizes = [8, 128], strides = [1, 1]} : vector<64x128xf32> to vector<8x128xf32>
    %89 = arith.truncf %87 : vector<8x32xf32> to vector<8x32xbf16>
    %cst_17 = arith.constant dense<0.000000e+00> : vector<8x128xf32>
    %90 = tpu.matmul %89, %9, %cst_17 {dimension_numbers = #tpu.dot_dimension_numbers<[1], [0], [0], [1], [0, 0, 1, 1], [], []>} : vector<8x32xbf16>, vector<32x128xbf16>, vector<8x128xf32> -> vector<8x128xf32>
    %91 = arith.addf %88, %90 : vector<8x128xf32>
    %92 = arith.negf %91 : vector<8x128xf32>
    %93 = math.exp %92 : vector<8x128xf32>
    %cst_18 = arith.constant 1.000000e+00 : f32
    %94 = vector.broadcast %cst_18 : f32 to vector<8x128xf32>
    %95 = arith.addf %94, %93 : vector<8x128xf32>
    %96 = arith.divf %94, %95 : vector<8x128xf32>
    %97 = math.tanh %91 : vector<8x128xf32>
    %98 = vector.extract_strided_slice %96 {offsets = [0, 0], sizes = [8, 32], strides = [1, 1]} : vector<8x128xf32> to vector<8x32xf32>
    %99 = vector.extract_strided_slice %96 {offsets = [0, 32], sizes = [8, 32], strides = [1, 1]} : vector<8x128xf32> to vector<8x32xf32>
    %100 = vector.extract_strided_slice %97 {offsets = [0, 64], sizes = [8, 32], strides = [1, 1]} : vector<8x128xf32> to vector<8x32xf32>
    %101 = vector.extract_strided_slice %96 {offsets = [0, 96], sizes = [8, 32], strides = [1, 1]} : vector<8x128xf32> to vector<8x32xf32>
    %102 = arith.mulf %99, %85 : vector<8x32xf32>
    %103 = arith.mulf %98, %100 : vector<8x32xf32>
    %104 = arith.addf %102, %103 : vector<8x32xf32>
    %105 = math.tanh %104 : vector<8x32xf32>
    %106 = arith.mulf %101, %105 : vector<8x32xf32>
    %107 = vector.extract_strided_slice %7 {offsets = [40, 0], sizes = [8, 128], strides = [1, 1]} : vector<64x128xf32> to vector<8x128xf32>
    %108 = arith.truncf %106 : vector<8x32xf32> to vector<8x32xbf16>
    %cst_19 = arith.constant dense<0.000000e+00> : vector<8x128xf32>
    %109 = tpu.matmul %108, %9, %cst_19 {dimension_numbers = #tpu.dot_dimension_numbers<[1], [0], [0], [1], [0, 0, 1, 1], [], []>} : vector<8x32xbf16>, vector<32x128xbf16>, vector<8x128xf32> -> vector<8x128xf32>
    %110 = arith.addf %107, %109 : vector<8x128xf32>
    %111 = arith.negf %110 : vector<8x128xf32>
    %112 = math.exp %111 : vector<8x128xf32>
    %cst_20 = arith.constant 1.000000e+00 : f32
    %113 = vector.broadcast %cst_20 : f32 to vector<8x128xf32>
    %114 = arith.addf %113, %112 : vector<8x128xf32>
    %115 = arith.divf %113, %114 : vector<8x128xf32>
    %116 = math.tanh %110 : vector<8x128xf32>
    %117 = vector.extract_strided_slice %115 {offsets = [0, 0], sizes = [8, 32], strides = [1, 1]} : vector<8x128xf32> to vector<8x32xf32>
    %118 = vector.extract_strided_slice %115 {offsets = [0, 32], sizes = [8, 32], strides = [1, 1]} : vector<8x128xf32> to vector<8x32xf32>
    %119 = vector.extract_strided_slice %116 {offsets = [0, 64], sizes = [8, 32], strides = [1, 1]} : vector<8x128xf32> to vector<8x32xf32>
    %120 = vector.extract_strided_slice %115 {offsets = [0, 96], sizes = [8, 32], strides = [1, 1]} : vector<8x128xf32> to vector<8x32xf32>
    %121 = arith.mulf %118, %104 : vector<8x32xf32>
    %122 = arith.mulf %117, %119 : vector<8x32xf32>
    %123 = arith.addf %121, %122 : vector<8x32xf32>
    %124 = math.tanh %123 : vector<8x32xf32>
    %125 = arith.mulf %120, %124 : vector<8x32xf32>
    %126 = vector.extract_strided_slice %7 {offsets = [48, 0], sizes = [8, 128], strides = [1, 1]} : vector<64x128xf32> to vector<8x128xf32>
    %127 = arith.truncf %125 : vector<8x32xf32> to vector<8x32xbf16>
    %cst_21 = arith.constant dense<0.000000e+00> : vector<8x128xf32>
    %128 = tpu.matmul %127, %9, %cst_21 {dimension_numbers = #tpu.dot_dimension_numbers<[1], [0], [0], [1], [0, 0, 1, 1], [], []>} : vector<8x32xbf16>, vector<32x128xbf16>, vector<8x128xf32> -> vector<8x128xf32>
    %129 = arith.addf %126, %128 : vector<8x128xf32>
    %130 = arith.negf %129 : vector<8x128xf32>
    %131 = math.exp %130 : vector<8x128xf32>
    %cst_22 = arith.constant 1.000000e+00 : f32
    %132 = vector.broadcast %cst_22 : f32 to vector<8x128xf32>
    %133 = arith.addf %132, %131 : vector<8x128xf32>
    %134 = arith.divf %132, %133 : vector<8x128xf32>
    %135 = math.tanh %129 : vector<8x128xf32>
    %136 = vector.extract_strided_slice %134 {offsets = [0, 0], sizes = [8, 32], strides = [1, 1]} : vector<8x128xf32> to vector<8x32xf32>
    %137 = vector.extract_strided_slice %134 {offsets = [0, 32], sizes = [8, 32], strides = [1, 1]} : vector<8x128xf32> to vector<8x32xf32>
    %138 = vector.extract_strided_slice %135 {offsets = [0, 64], sizes = [8, 32], strides = [1, 1]} : vector<8x128xf32> to vector<8x32xf32>
    %139 = vector.extract_strided_slice %134 {offsets = [0, 96], sizes = [8, 32], strides = [1, 1]} : vector<8x128xf32> to vector<8x32xf32>
    %140 = arith.mulf %137, %123 : vector<8x32xf32>
    %141 = arith.mulf %136, %138 : vector<8x32xf32>
    %142 = arith.addf %140, %141 : vector<8x32xf32>
    %143 = math.tanh %142 : vector<8x32xf32>
    %144 = arith.mulf %139, %143 : vector<8x32xf32>
    %145 = vector.extract_strided_slice %7 {offsets = [56, 0], sizes = [8, 128], strides = [1, 1]} : vector<64x128xf32> to vector<8x128xf32>
    %146 = arith.truncf %144 : vector<8x32xf32> to vector<8x32xbf16>
    %cst_23 = arith.constant dense<0.000000e+00> : vector<8x128xf32>
    %147 = tpu.matmul %146, %9, %cst_23 {dimension_numbers = #tpu.dot_dimension_numbers<[1], [0], [0], [1], [0, 0, 1, 1], [], []>} : vector<8x32xbf16>, vector<32x128xbf16>, vector<8x128xf32> -> vector<8x128xf32>
    %148 = arith.addf %145, %147 : vector<8x128xf32>
    %149 = arith.negf %148 : vector<8x128xf32>
    %150 = math.exp %149 : vector<8x128xf32>
    %cst_24 = arith.constant 1.000000e+00 : f32
    %151 = vector.broadcast %cst_24 : f32 to vector<8x128xf32>
    %152 = arith.addf %151, %150 : vector<8x128xf32>
    %153 = arith.divf %151, %152 : vector<8x128xf32>
    %154 = math.tanh %148 : vector<8x128xf32>
    %155 = vector.extract_strided_slice %153 {offsets = [0, 0], sizes = [8, 32], strides = [1, 1]} : vector<8x128xf32> to vector<8x32xf32>
    %156 = vector.extract_strided_slice %153 {offsets = [0, 32], sizes = [8, 32], strides = [1, 1]} : vector<8x128xf32> to vector<8x32xf32>
    %157 = vector.extract_strided_slice %154 {offsets = [0, 64], sizes = [8, 32], strides = [1, 1]} : vector<8x128xf32> to vector<8x32xf32>
    %158 = vector.extract_strided_slice %153 {offsets = [0, 96], sizes = [8, 32], strides = [1, 1]} : vector<8x128xf32> to vector<8x32xf32>
    %159 = arith.mulf %156, %142 : vector<8x32xf32>
    %160 = arith.mulf %155, %157 : vector<8x32xf32>
    %161 = arith.addf %159, %160 : vector<8x32xf32>
    %162 = math.tanh %161 : vector<8x32xf32>
    %163 = arith.mulf %158, %162 : vector<8x32xf32>
    %c0_25 = arith.constant 0 : index
    %c0_26 = arith.constant 0 : index
    %164 = vector.load %arg4[%c0_25, %c0_26] : memref<32x128xf32, #tpu.memory_space<vmem>>, vector<32x128xf32>
    %165 = arith.truncf %164 : vector<32x128xf32> to vector<32x128xbf16>
    %c0_27 = arith.constant 0 : index
    %c0_28 = arith.constant 0 : index
    %166 = vector.load %arg5[%c0_27, %c0_28] : memref<32x128xf32, #tpu.memory_space<vmem>>, vector<32x128xf32>
    %167 = arith.truncf %166 : vector<32x128xf32> to vector<32x128xbf16>
    %c0_29 = arith.constant 0 : index
    %c0_30 = arith.constant 0 : index
    %168 = vector.load %arg6[%c0_29, %c0_30] : memref<1x128xf32, #tpu.memory_space<vmem>>, vector<1x128xf32>
    %169 = vector.shape_cast %168 : vector<1x128xf32> to vector<1x128xf32>
    %170 = vector.broadcast %169 : vector<1x128xf32> to vector<8x128xf32>
    %cst_31 = arith.constant 0.000000e+00 : f32
    %171 = vector.broadcast %cst_31 : f32 to vector<8x32xf32>
    %cst_32 = arith.constant 0.000000e+00 : f32
    %172 = vector.broadcast %cst_32 : f32 to vector<8x32xf32>
    %173 = arith.truncf %30 : vector<8x32xf32> to vector<8x32xbf16>
    %cst_33 = arith.constant dense<0.000000e+00> : vector<8x128xf32>
    %174 = tpu.matmul %173, %165, %cst_33 {dimension_numbers = #tpu.dot_dimension_numbers<[1], [0], [0], [1], [0, 0, 1, 1], [], []>} : vector<8x32xbf16>, vector<32x128xbf16>, vector<8x128xf32> -> vector<8x128xf32>
    %175 = arith.addf %174, %170 : vector<8x128xf32>
    %176 = arith.truncf %171 : vector<8x32xf32> to vector<8x32xbf16>
    %cst_34 = arith.constant dense<0.000000e+00> : vector<8x128xf32>
    %177 = tpu.matmul %176, %167, %cst_34 {dimension_numbers = #tpu.dot_dimension_numbers<[1], [0], [0], [1], [0, 0, 1, 1], [], []>} : vector<8x32xbf16>, vector<32x128xbf16>, vector<8x128xf32> -> vector<8x128xf32>
    %178 = arith.addf %175, %177 : vector<8x128xf32>
    %179 = arith.negf %178 : vector<8x128xf32>
    %180 = math.exp %179 : vector<8x128xf32>
    %cst_35 = arith.constant 1.000000e+00 : f32
    %181 = vector.broadcast %cst_35 : f32 to vector<8x128xf32>
    %182 = arith.addf %181, %180 : vector<8x128xf32>
    %183 = arith.divf %181, %182 : vector<8x128xf32>
    %184 = math.tanh %178 : vector<8x128xf32>
    %185 = vector.extract_strided_slice %183 {offsets = [0, 0], sizes = [8, 32], strides = [1, 1]} : vector<8x128xf32> to vector<8x32xf32>
    %186 = vector.extract_strided_slice %183 {offsets = [0, 32], sizes = [8, 32], strides = [1, 1]} : vector<8x128xf32> to vector<8x32xf32>
    %187 = vector.extract_strided_slice %184 {offsets = [0, 64], sizes = [8, 32], strides = [1, 1]} : vector<8x128xf32> to vector<8x32xf32>
    %188 = vector.extract_strided_slice %183 {offsets = [0, 96], sizes = [8, 32], strides = [1, 1]} : vector<8x128xf32> to vector<8x32xf32>
    %189 = arith.mulf %186, %172 : vector<8x32xf32>
    %190 = arith.mulf %185, %187 : vector<8x32xf32>
    %191 = arith.addf %189, %190 : vector<8x32xf32>
    %192 = math.tanh %191 : vector<8x32xf32>
    %193 = arith.mulf %188, %192 : vector<8x32xf32>
    %194 = arith.truncf %49 : vector<8x32xf32> to vector<8x32xbf16>
    %cst_36 = arith.constant dense<0.000000e+00> : vector<8x128xf32>
    %195 = tpu.matmul %194, %165, %cst_36 {dimension_numbers = #tpu.dot_dimension_numbers<[1], [0], [0], [1], [0, 0, 1, 1], [], []>} : vector<8x32xbf16>, vector<32x128xbf16>, vector<8x128xf32> -> vector<8x128xf32>
    %196 = arith.addf %195, %170 : vector<8x128xf32>
    %197 = arith.truncf %193 : vector<8x32xf32> to vector<8x32xbf16>
    %cst_37 = arith.constant dense<0.000000e+00> : vector<8x128xf32>
    %198 = tpu.matmul %197, %167, %cst_37 {dimension_numbers = #tpu.dot_dimension_numbers<[1], [0], [0], [1], [0, 0, 1, 1], [], []>} : vector<8x32xbf16>, vector<32x128xbf16>, vector<8x128xf32> -> vector<8x128xf32>
    %199 = arith.addf %196, %198 : vector<8x128xf32>
    %200 = arith.negf %199 : vector<8x128xf32>
    %201 = math.exp %200 : vector<8x128xf32>
    %cst_38 = arith.constant 1.000000e+00 : f32
    %202 = vector.broadcast %cst_38 : f32 to vector<8x128xf32>
    %203 = arith.addf %202, %201 : vector<8x128xf32>
    %204 = arith.divf %202, %203 : vector<8x128xf32>
    %205 = math.tanh %199 : vector<8x128xf32>
    %206 = vector.extract_strided_slice %204 {offsets = [0, 0], sizes = [8, 32], strides = [1, 1]} : vector<8x128xf32> to vector<8x32xf32>
    %207 = vector.extract_strided_slice %204 {offsets = [0, 32], sizes = [8, 32], strides = [1, 1]} : vector<8x128xf32> to vector<8x32xf32>
    %208 = vector.extract_strided_slice %205 {offsets = [0, 64], sizes = [8, 32], strides = [1, 1]} : vector<8x128xf32> to vector<8x32xf32>
    %209 = vector.extract_strided_slice %204 {offsets = [0, 96], sizes = [8, 32], strides = [1, 1]} : vector<8x128xf32> to vector<8x32xf32>
    %210 = arith.mulf %207, %191 : vector<8x32xf32>
    %211 = arith.mulf %206, %208 : vector<8x32xf32>
    %212 = arith.addf %210, %211 : vector<8x32xf32>
    %213 = math.tanh %212 : vector<8x32xf32>
    %214 = arith.mulf %209, %213 : vector<8x32xf32>
    %215 = arith.truncf %68 : vector<8x32xf32> to vector<8x32xbf16>
    %cst_39 = arith.constant dense<0.000000e+00> : vector<8x128xf32>
    %216 = tpu.matmul %215, %165, %cst_39 {dimension_numbers = #tpu.dot_dimension_numbers<[1], [0], [0], [1], [0, 0, 1, 1], [], []>} : vector<8x32xbf16>, vector<32x128xbf16>, vector<8x128xf32> -> vector<8x128xf32>
    %217 = arith.addf %216, %170 : vector<8x128xf32>
    %218 = arith.truncf %214 : vector<8x32xf32> to vector<8x32xbf16>
    %cst_40 = arith.constant dense<0.000000e+00> : vector<8x128xf32>
    %219 = tpu.matmul %218, %167, %cst_40 {dimension_numbers = #tpu.dot_dimension_numbers<[1], [0], [0], [1], [0, 0, 1, 1], [], []>} : vector<8x32xbf16>, vector<32x128xbf16>, vector<8x128xf32> -> vector<8x128xf32>
    %220 = arith.addf %217, %219 : vector<8x128xf32>
    %221 = arith.negf %220 : vector<8x128xf32>
    %222 = math.exp %221 : vector<8x128xf32>
    %cst_41 = arith.constant 1.000000e+00 : f32
    %223 = vector.broadcast %cst_41 : f32 to vector<8x128xf32>
    %224 = arith.addf %223, %222 : vector<8x128xf32>
    %225 = arith.divf %223, %224 : vector<8x128xf32>
    %226 = math.tanh %220 : vector<8x128xf32>
    %227 = vector.extract_strided_slice %225 {offsets = [0, 0], sizes = [8, 32], strides = [1, 1]} : vector<8x128xf32> to vector<8x32xf32>
    %228 = vector.extract_strided_slice %225 {offsets = [0, 32], sizes = [8, 32], strides = [1, 1]} : vector<8x128xf32> to vector<8x32xf32>
    %229 = vector.extract_strided_slice %226 {offsets = [0, 64], sizes = [8, 32], strides = [1, 1]} : vector<8x128xf32> to vector<8x32xf32>
    %230 = vector.extract_strided_slice %225 {offsets = [0, 96], sizes = [8, 32], strides = [1, 1]} : vector<8x128xf32> to vector<8x32xf32>
    %231 = arith.mulf %228, %212 : vector<8x32xf32>
    %232 = arith.mulf %227, %229 : vector<8x32xf32>
    %233 = arith.addf %231, %232 : vector<8x32xf32>
    %234 = math.tanh %233 : vector<8x32xf32>
    %235 = arith.mulf %230, %234 : vector<8x32xf32>
    %236 = arith.truncf %87 : vector<8x32xf32> to vector<8x32xbf16>
    %cst_42 = arith.constant dense<0.000000e+00> : vector<8x128xf32>
    %237 = tpu.matmul %236, %165, %cst_42 {dimension_numbers = #tpu.dot_dimension_numbers<[1], [0], [0], [1], [0, 0, 1, 1], [], []>} : vector<8x32xbf16>, vector<32x128xbf16>, vector<8x128xf32> -> vector<8x128xf32>
    %238 = arith.addf %237, %170 : vector<8x128xf32>
    %239 = arith.truncf %235 : vector<8x32xf32> to vector<8x32xbf16>
    %cst_43 = arith.constant dense<0.000000e+00> : vector<8x128xf32>
    %240 = tpu.matmul %239, %167, %cst_43 {dimension_numbers = #tpu.dot_dimension_numbers<[1], [0], [0], [1], [0, 0, 1, 1], [], []>} : vector<8x32xbf16>, vector<32x128xbf16>, vector<8x128xf32> -> vector<8x128xf32>
    %241 = arith.addf %238, %240 : vector<8x128xf32>
    %242 = arith.negf %241 : vector<8x128xf32>
    %243 = math.exp %242 : vector<8x128xf32>
    %cst_44 = arith.constant 1.000000e+00 : f32
    %244 = vector.broadcast %cst_44 : f32 to vector<8x128xf32>
    %245 = arith.addf %244, %243 : vector<8x128xf32>
    %246 = arith.divf %244, %245 : vector<8x128xf32>
    %247 = math.tanh %241 : vector<8x128xf32>
    %248 = vector.extract_strided_slice %246 {offsets = [0, 0], sizes = [8, 32], strides = [1, 1]} : vector<8x128xf32> to vector<8x32xf32>
    %249 = vector.extract_strided_slice %246 {offsets = [0, 32], sizes = [8, 32], strides = [1, 1]} : vector<8x128xf32> to vector<8x32xf32>
    %250 = vector.extract_strided_slice %247 {offsets = [0, 64], sizes = [8, 32], strides = [1, 1]} : vector<8x128xf32> to vector<8x32xf32>
    %251 = vector.extract_strided_slice %246 {offsets = [0, 96], sizes = [8, 32], strides = [1, 1]} : vector<8x128xf32> to vector<8x32xf32>
    %252 = arith.mulf %249, %233 : vector<8x32xf32>
    %253 = arith.mulf %248, %250 : vector<8x32xf32>
    %254 = arith.addf %252, %253 : vector<8x32xf32>
    %255 = math.tanh %254 : vector<8x32xf32>
    %256 = arith.mulf %251, %255 : vector<8x32xf32>
    %257 = arith.truncf %106 : vector<8x32xf32> to vector<8x32xbf16>
    %cst_45 = arith.constant dense<0.000000e+00> : vector<8x128xf32>
    %258 = tpu.matmul %257, %165, %cst_45 {dimension_numbers = #tpu.dot_dimension_numbers<[1], [0], [0], [1], [0, 0, 1, 1], [], []>} : vector<8x32xbf16>, vector<32x128xbf16>, vector<8x128xf32> -> vector<8x128xf32>
    %259 = arith.addf %258, %170 : vector<8x128xf32>
    %260 = arith.truncf %256 : vector<8x32xf32> to vector<8x32xbf16>
    %cst_46 = arith.constant dense<0.000000e+00> : vector<8x128xf32>
    %261 = tpu.matmul %260, %167, %cst_46 {dimension_numbers = #tpu.dot_dimension_numbers<[1], [0], [0], [1], [0, 0, 1, 1], [], []>} : vector<8x32xbf16>, vector<32x128xbf16>, vector<8x128xf32> -> vector<8x128xf32>
    %262 = arith.addf %259, %261 : vector<8x128xf32>
    %263 = arith.negf %262 : vector<8x128xf32>
    %264 = math.exp %263 : vector<8x128xf32>
    %cst_47 = arith.constant 1.000000e+00 : f32
    %265 = vector.broadcast %cst_47 : f32 to vector<8x128xf32>
    %266 = arith.addf %265, %264 : vector<8x128xf32>
    %267 = arith.divf %265, %266 : vector<8x128xf32>
    %268 = math.tanh %262 : vector<8x128xf32>
    %269 = vector.extract_strided_slice %267 {offsets = [0, 0], sizes = [8, 32], strides = [1, 1]} : vector<8x128xf32> to vector<8x32xf32>
    %270 = vector.extract_strided_slice %267 {offsets = [0, 32], sizes = [8, 32], strides = [1, 1]} : vector<8x128xf32> to vector<8x32xf32>
    %271 = vector.extract_strided_slice %268 {offsets = [0, 64], sizes = [8, 32], strides = [1, 1]} : vector<8x128xf32> to vector<8x32xf32>
    %272 = vector.extract_strided_slice %267 {offsets = [0, 96], sizes = [8, 32], strides = [1, 1]} : vector<8x128xf32> to vector<8x32xf32>
    %273 = arith.mulf %270, %254 : vector<8x32xf32>
    %274 = arith.mulf %269, %271 : vector<8x32xf32>
    %275 = arith.addf %273, %274 : vector<8x32xf32>
    %276 = math.tanh %275 : vector<8x32xf32>
    %277 = arith.mulf %272, %276 : vector<8x32xf32>
    %278 = arith.truncf %125 : vector<8x32xf32> to vector<8x32xbf16>
    %cst_48 = arith.constant dense<0.000000e+00> : vector<8x128xf32>
    %279 = tpu.matmul %278, %165, %cst_48 {dimension_numbers = #tpu.dot_dimension_numbers<[1], [0], [0], [1], [0, 0, 1, 1], [], []>} : vector<8x32xbf16>, vector<32x128xbf16>, vector<8x128xf32> -> vector<8x128xf32>
    %280 = arith.addf %279, %170 : vector<8x128xf32>
    %281 = arith.truncf %277 : vector<8x32xf32> to vector<8x32xbf16>
    %cst_49 = arith.constant dense<0.000000e+00> : vector<8x128xf32>
    %282 = tpu.matmul %281, %167, %cst_49 {dimension_numbers = #tpu.dot_dimension_numbers<[1], [0], [0], [1], [0, 0, 1, 1], [], []>} : vector<8x32xbf16>, vector<32x128xbf16>, vector<8x128xf32> -> vector<8x128xf32>
    %283 = arith.addf %280, %282 : vector<8x128xf32>
    %284 = arith.negf %283 : vector<8x128xf32>
    %285 = math.exp %284 : vector<8x128xf32>
    %cst_50 = arith.constant 1.000000e+00 : f32
    %286 = vector.broadcast %cst_50 : f32 to vector<8x128xf32>
    %287 = arith.addf %286, %285 : vector<8x128xf32>
    %288 = arith.divf %286, %287 : vector<8x128xf32>
    %289 = math.tanh %283 : vector<8x128xf32>
    %290 = vector.extract_strided_slice %288 {offsets = [0, 0], sizes = [8, 32], strides = [1, 1]} : vector<8x128xf32> to vector<8x32xf32>
    %291 = vector.extract_strided_slice %288 {offsets = [0, 32], sizes = [8, 32], strides = [1, 1]} : vector<8x128xf32> to vector<8x32xf32>
    %292 = vector.extract_strided_slice %289 {offsets = [0, 64], sizes = [8, 32], strides = [1, 1]} : vector<8x128xf32> to vector<8x32xf32>
    %293 = vector.extract_strided_slice %288 {offsets = [0, 96], sizes = [8, 32], strides = [1, 1]} : vector<8x128xf32> to vector<8x32xf32>
    %294 = arith.mulf %291, %275 : vector<8x32xf32>
    %295 = arith.mulf %290, %292 : vector<8x32xf32>
    %296 = arith.addf %294, %295 : vector<8x32xf32>
    %297 = math.tanh %296 : vector<8x32xf32>
    %298 = arith.mulf %293, %297 : vector<8x32xf32>
    %299 = arith.truncf %144 : vector<8x32xf32> to vector<8x32xbf16>
    %cst_51 = arith.constant dense<0.000000e+00> : vector<8x128xf32>
    %300 = tpu.matmul %299, %165, %cst_51 {dimension_numbers = #tpu.dot_dimension_numbers<[1], [0], [0], [1], [0, 0, 1, 1], [], []>} : vector<8x32xbf16>, vector<32x128xbf16>, vector<8x128xf32> -> vector<8x128xf32>
    %301 = arith.addf %300, %170 : vector<8x128xf32>
    %302 = arith.truncf %298 : vector<8x32xf32> to vector<8x32xbf16>
    %cst_52 = arith.constant dense<0.000000e+00> : vector<8x128xf32>
    %303 = tpu.matmul %302, %167, %cst_52 {dimension_numbers = #tpu.dot_dimension_numbers<[1], [0], [0], [1], [0, 0, 1, 1], [], []>} : vector<8x32xbf16>, vector<32x128xbf16>, vector<8x128xf32> -> vector<8x128xf32>
    %304 = arith.addf %301, %303 : vector<8x128xf32>
    %305 = arith.negf %304 : vector<8x128xf32>
    %306 = math.exp %305 : vector<8x128xf32>
    %cst_53 = arith.constant 1.000000e+00 : f32
    %307 = vector.broadcast %cst_53 : f32 to vector<8x128xf32>
    %308 = arith.addf %307, %306 : vector<8x128xf32>
    %309 = arith.divf %307, %308 : vector<8x128xf32>
    %310 = math.tanh %304 : vector<8x128xf32>
    %311 = vector.extract_strided_slice %309 {offsets = [0, 0], sizes = [8, 32], strides = [1, 1]} : vector<8x128xf32> to vector<8x32xf32>
    %312 = vector.extract_strided_slice %309 {offsets = [0, 32], sizes = [8, 32], strides = [1, 1]} : vector<8x128xf32> to vector<8x32xf32>
    %313 = vector.extract_strided_slice %310 {offsets = [0, 64], sizes = [8, 32], strides = [1, 1]} : vector<8x128xf32> to vector<8x32xf32>
    %314 = vector.extract_strided_slice %309 {offsets = [0, 96], sizes = [8, 32], strides = [1, 1]} : vector<8x128xf32> to vector<8x32xf32>
    %315 = arith.mulf %312, %296 : vector<8x32xf32>
    %316 = arith.mulf %311, %313 : vector<8x32xf32>
    %317 = arith.addf %315, %316 : vector<8x32xf32>
    %318 = math.tanh %317 : vector<8x32xf32>
    %319 = arith.mulf %314, %318 : vector<8x32xf32>
    %320 = arith.truncf %163 : vector<8x32xf32> to vector<8x32xbf16>
    %cst_54 = arith.constant dense<0.000000e+00> : vector<8x128xf32>
    %321 = tpu.matmul %320, %165, %cst_54 {dimension_numbers = #tpu.dot_dimension_numbers<[1], [0], [0], [1], [0, 0, 1, 1], [], []>} : vector<8x32xbf16>, vector<32x128xbf16>, vector<8x128xf32> -> vector<8x128xf32>
    %322 = arith.addf %321, %170 : vector<8x128xf32>
    %323 = arith.truncf %319 : vector<8x32xf32> to vector<8x32xbf16>
    %cst_55 = arith.constant dense<0.000000e+00> : vector<8x128xf32>
    %324 = tpu.matmul %323, %167, %cst_55 {dimension_numbers = #tpu.dot_dimension_numbers<[1], [0], [0], [1], [0, 0, 1, 1], [], []>} : vector<8x32xbf16>, vector<32x128xbf16>, vector<8x128xf32> -> vector<8x128xf32>
    %325 = arith.addf %322, %324 : vector<8x128xf32>
    %326 = arith.negf %325 : vector<8x128xf32>
    %327 = math.exp %326 : vector<8x128xf32>
    %cst_56 = arith.constant 1.000000e+00 : f32
    %328 = vector.broadcast %cst_56 : f32 to vector<8x128xf32>
    %329 = arith.addf %328, %327 : vector<8x128xf32>
    %330 = arith.divf %328, %329 : vector<8x128xf32>
    %331 = math.tanh %325 : vector<8x128xf32>
    %332 = vector.extract_strided_slice %330 {offsets = [0, 0], sizes = [8, 32], strides = [1, 1]} : vector<8x128xf32> to vector<8x32xf32>
    %333 = vector.extract_strided_slice %330 {offsets = [0, 32], sizes = [8, 32], strides = [1, 1]} : vector<8x128xf32> to vector<8x32xf32>
    %334 = vector.extract_strided_slice %331 {offsets = [0, 64], sizes = [8, 32], strides = [1, 1]} : vector<8x128xf32> to vector<8x32xf32>
    %335 = vector.extract_strided_slice %330 {offsets = [0, 96], sizes = [8, 32], strides = [1, 1]} : vector<8x128xf32> to vector<8x32xf32>
    %336 = arith.mulf %333, %317 : vector<8x32xf32>
    %337 = arith.mulf %332, %334 : vector<8x32xf32>
    %338 = arith.addf %336, %337 : vector<8x32xf32>
    %339 = math.tanh %338 : vector<8x32xf32>
    %340 = arith.mulf %335, %339 : vector<8x32xf32>
    %c0_57 = arith.constant 0 : index
    %c0_58 = arith.constant 0 : index
    %341 = vector.load %arg7[%c0_57, %c0_58] : memref<32x128xf32, #tpu.memory_space<vmem>>, vector<32x128xf32>
    %342 = arith.truncf %340 : vector<8x32xf32> to vector<8x32xbf16>
    %343 = arith.truncf %341 : vector<32x128xf32> to vector<32x128xbf16>
    %cst_59 = arith.constant dense<0.000000e+00> : vector<8x128xf32>
    %344 = tpu.matmul %342, %343, %cst_59 {dimension_numbers = #tpu.dot_dimension_numbers<[1], [0], [0], [1], [0, 0, 1, 1], [], []>} : vector<8x32xbf16>, vector<32x128xbf16>, vector<8x128xf32> -> vector<8x128xf32>
    %c0_60 = arith.constant 0 : index
    %c0_61 = arith.constant 0 : index
    %345 = vector.load %arg8[%c0_60, %c0_61] : memref<1x128xf32, #tpu.memory_space<vmem>>, vector<1x128xf32>
    %346 = vector.broadcast %345 : vector<1x128xf32> to vector<8x128xf32>
    %347 = arith.addf %344, %346 : vector<8x128xf32>
    %c0_62 = arith.constant 0 : index
    %c0_63 = arith.constant 0 : index
    %348 = vector.load %arg9[%c0_62, %c0_63] : memref<8x128xf32, #tpu.memory_space<vmem>>, vector<8x128xf32>
    tpu.vector_store %arg9[%c0_62, %c0_63], %347 {strides = array<i32>} : memref<8x128xf32, #tpu.memory_space<vmem>>, vector<8x128xf32>,
    return
  }
}

</mosaic_0001>

<bundles_post_ra>
// kernel: lstm_model_forward.1
= control target key start
LH: loop header
LB: loop body
LE: loop exit
PB: predicated region body
PF: predicated region fallthrough
CT: control target
= control target key end

     0   :  { %v2201_v0 = vmov 0.0   ;;  %vm2202_vm0 = vmmov 0   ;;  %vm55_vm1 = vcmask 130048   ;;  %v2203_v16 = vmov 0   ;;  %s2204_s29 = smov 64   ;;  %s2677_s1 = inlined_call_operand.vmem [shape: f32[16,128], index: 1, kind: input, shape index: {}]   ;;  %s2678_s2 = inlined_call_operand.vmem [shape: f32[32,128], index: 2, kind: input, shape index: {}]   ;;  %s2679_s0 = inlined_call_operand.vmem [shape: f32[64,16], index: 0, kind: input, shape index: {}]   ;;  %s2680_s3 = inlined_call_operand.vmem [shape: f32[1,128], index: 3, kind: input, shape index: {}]   ;;  %s2681_s4 = inlined_call_operand.vmem [shape: f32[32,128], index: 4, kind: input, shape index: {}]   ;;  %s2682_s5 = inlined_call_operand.vmem [shape: f32[32,128], index: 5, kind: input, shape index: {}]   ;;  %s2683_s6 = inlined_call_operand.vmem [shape: f32[1,128], index: 6, kind: input, shape index: {}]   ;;  %s2684_s7 = inlined_call_operand.vmem [shape: f32[32,128], index: 7, kind: input, shape index: {}]   ;;  %s2685_s8 = inlined_call_operand.vmem [shape: f32[1,128], index: 8, kind: input, shape index: {}]   ;;  %s2686_s9 = inlined_call_operand.vmem [shape: f32[8,128], index: 9, kind: output, shape index: {}]  }
   0x1   :  { %1828 = vmatprep.subr.bf16.mxu1 %v2201_v0  ;;  %v41_v1 = vld [vmem:[%s2677_s1] sm:$0xff]  ;;  %v42_v2 = vld [vmem:[%s2677_s1 + $0x8] sm:$0xff]  ;;  %1832 = vmatprep.mubr.msk.bf16.mxu1 %vm2202_vm0, %v2201_v0  ;;  %v35_v10 = vld [vmem:[%s2679_s0 + $0x10] sm:$0xff]  ;;  %vm139_vm2 = vcmask 261120  }
   0x2   :  { %v133_v3 = vld [vmem:[%s2678_s2] sm:$0xff]  ;;  %v47_v4 = vpack.c.bf16 %v42_v2, %v41_v1  ;;  %v134_v5 = vld [vmem:[%s2678_s2 + $0x8] sm:$0xff]  ;;  %v36_v11 = vld [vmem:[%s2679_s0 + $0x18] sm:$0xff] }
   0x3   :  { %v33_v6 = vld [vmem:[%s2679_s0] sm:$0xff]  ;;  %v34_v7 = vld [vmem:[%s2679_s0 + $0x8] sm:$0xff]  ;;  %v2277_v8 = vpack.c.bf16 %v134_v5, %v133_v3  ;;  %v135_v12 = vld [vmem:[%s2678_s2 + $0x10] sm:$0xff]  ;;  %v44_v13 = vpack.c.bf16 %v36_v11, %v35_v10 }
   0x4   :  { %v43_v9 = vpack.c.bf16 %v34_v7, %v33_v6  ;;  %1818 = vmatprep.subr.bf16.mxu0 %v47_v4  ;;  %v136_v14 = vld [vmem:[%s2678_s2 + $0x18] sm:$0xff]  ;;  %v2314_v17 = vld [vmem:[%s2680_s3] ss:$0 sm:$0xff]  ;;  %s2205_s3 = smov 32   ;;  %v38_v60 = vld [vmem:[%s2679_s0 + $0x28] sm:$0xff] }
   0x5   :  { %1829 = vmatpush3.bf16.msra.mxu1 %v2277_v8  ;;  %1819 = vmatpush3.bf16.msra.mxu0 %v47_v4  ;;  %v2292_v15 = vpack.c.bf16 %v136_v14, %v135_v12  ;;  %v37_v59 = vld [vmem:[%s2679_s0 + $0x20] sm:$0xff]  ;;  %v39_v61 = vld [vmem:[%s2679_s0 + $0x30] sm:$0xff]  ;;  %v40_v63 = vld [vmem:[%s2679_s0 + $0x38] sm:$0xff] }
   0x6   :  { %1820 = vmatprep.mubr.msk.bf16.mxu0 %vm55_vm1, %v43_v9  ;;  %1830 = vmatprep.subr.bf16.mxu1 %v2201_v0  ;;  %v45_v62 = vpack.c.bf16 %v38_v60, %v37_v59  ;;  %v46_v1 = vpack.c.bf16 %v40_v63, %v39_v61 }
   0x7   :  { %1844 = vmatprep.subr.bf16.mxu0 %v2201_v0 }
   0x8   :  { %1821 = vmatmul.mubr.msk.bf16.vlgmr.msra.gmra.mrb[0].mxu0 %vm55_vm1, %v44_v13 }
   0x9   :  { %1831 = vmatpush3.bf16.msra.mxu1 %v2292_v15  ;;  %1845 = vmatpush3.bf16.msra.mxu0 %v2277_v8 }
   0xa   :  { %1836 = vmatprep.subr.bf16.mxu1 %v2201_v0  ;;  %1846 = vmatprep.subr.bf16.mxu0 %v2201_v0 }
   0xb   :  { %1824 = vmatprep.mubr.msk.bf16.mxu0 %vm55_vm1, %v45_v62 }
   0xc   :  { %1833 = vmatmul.mubr.bf16.vlgmr.msra.gmra.mrb[0].mxu1 %v2203_v16 }
   0xd   :  { %1837 = vmatpush3.bf16.msra.mxu1 %v2277_v8  ;;  %1840 = vmatprep.mubr.msk.bf16.mxu1 %vm2202_vm0, %v2201_v0 }
   0xe   :  { %1838 = vmatprep.subr.bf16.mxu1 %v2201_v0  ;;  %1847 = vmatpush3.bf16.msra.mxu0 %v2292_v15 }
   0xf   :  { %1860 = vmatprep.subr.bf16.mxu0 %v2201_v0 }
  0x10   :  { %1825 = vmatmul.mubr.msk.bf16.gmra.mrb[4].mxu0 %vm55_vm1, %v46_v1 }
  0x11   :  { %1839 = vmatpush3.bf16.msra.mxu1 %v2292_v15  ;;  %1848 = vmatprep.mubr.msk.bf16.mxu0 %vm2202_vm0, %v2201_v0 }
  0x12   :  { %1852 = vmatprep.subr.bf16.mxu1 %v2201_v0 }
  0xdb   :  { %v2316_v18 = vpop.f32.mrb[0].mxu0 }
  0xdc   :  { %v102_v19 = vpop.f32.mrb[1].mxu0  ;;  %v111_v12 = vadd.f32 %v2316_v18, %v2314_v17 }
  0xdd   :  { %v103_v20 = vadd.f32 %v2314_v17, %v102_v19  ;;  %v2319_v21 = vpop.f32.mrb[2].mxu0 }
  0xde   :  { %v105_v22 = vpop.f32.mrb[3].mxu0 }
  0xdf   :  { %v177_v23 = vpop.f32.mrb[0].mxu1  ;;  %v106_v43 = vadd.f32 %v2314_v17, %v105_v22 }
  0xe0   :  { %v183_v24 = vadd.f32 %v177_v23, %v103_v20  ;;  %v1834_v25 = vpop.f32.mrb[1].mxu1 }
  0xe1   :  { %v180_v26 = vpop.f32.mrb[2].mxu1 }
  0xe2   :  { %2073 = vtanh.f32 %v183_v24  ;;  %v1835_v27 = vpop.f32.mrb[3].mxu1  ;;  %v1697_v29 = vmul.f32 -1.442695, %v183_v24 }
  0xe3   :  { %v2356_v6 = vpop.f32.mrb[4].mxu0 }
  0xe4   :  { %2075 = vpow2.f32 %v1697_v29  ;;  %v2358_v7 = vpop.f32.mrb[5].mxu0 }
  0xe5   :  { %v2360_v9 = vpop.f32.mrb[6].mxu0 }
  0xe6   :  { %v2362_v10 = vpop.f32.mrb[7].mxu0 }
  0xec   :  { %v2074_v28 = vpop.eup %2073 }
  0xed   :  { %193 = vrot.lane.b32.xlu0 %v2074_v28, %s2204_s29 }
  0xee   :  { %v2076_v30 = vpop.eup %2075 }
  0xef   :  { %v187_v31 = vadd.f32 1.0, %v2076_v30 }
  0xf1   :  { %2077 = vrcp.f32 %v187_v31 }
  0xfb   :  { %v2078_v32 = vpop.eup %2077 }
  0xfc   :  { %v191_v35 = vmul.f32 0.0, %v2078_v32 }
 0x15f   :  { %v194_v33 = vpop.permute.xlu0 %193 }
 0x160   :  { %v196_v34 = vmul.f32 %v2078_v32, %v194_v33 }
 0x162   :  { %198 = vrot.lane.b32.xlu0 %v196_v34, %s2205_s3 }
 0x1d4   :  { %v199_v36 = vpop.permute.xlu0 %198 }
 0x1d5   :  { %v201_v37 = vadd.f32 %v199_v36, %v191_v35 }
 0x1d7   :  { %2079 = vtanh.f32 %v201_v37 }
 0x1e1   :  { %v2080_v38 = vpop.eup %2079 }
 0x1e2   :  { %204 = vrot.lane.b32.xlu1 %v2080_v38, %s2204_s29 }
 0x254   :  { %v205_v39 = vpop.permute.xlu1 %204 }
 0x255   :  { %v207_v40 = vmul.f32 %v2078_v32, %v205_v39 }
 0x257   :  { %v208_v41 = vpack.c.bf16 %v207_v40, %v207_v40 }
 0x259   :  { %210 = vrot.lane.b32.xlu1 %v208_v41, %s2205_s3 }
 0x2cb   :  { %v2325_v42 = vpop.permute.xlu1 %210 }
 0x2cc   :  { %1841 = vmatmul.mubr.msk.bf16.vlgmr.msra.gmra.mrb[4].mxu1 %vm139_vm2, %v2325_v42 }
 0x2cd   :  { %1853 = vmatpush3.bf16.msra.mxu1 %v2277_v8  ;;  %1856 = vmatprep.mubr.msk.bf16.mxu1 %vm2202_vm0, %v2201_v0 }
 0x2ce   :  { %1854 = vmatprep.subr.bf16.mxu1 %v2201_v0 }
 0x2d1   :  { %1855 = vmatpush3.bf16.msra.mxu1 %v2292_v15 }
 0x2d2   :  { %1868 = vmatprep.subr.bf16.mxu1 %v2201_v0 }
 0x39f   :  { %v249_v44 = vpop.f32.mrb[4].mxu1 }
 0x3a0   :  { %v255_v45 = vadd.f32 %v249_v44, %v106_v43  ;;  %v1842_v46 = vpop.f32.mrb[5].mxu1 }
 0x3a1   :  { %v252_v47 = vpop.f32.mrb[6].mxu1 }
 0x3a2   :  { %2081 = vtanh.f32 %v255_v45  ;;  %v1843_v48 = vpop.f32.mrb[7].mxu1  ;;  %v1699_v50 = vmul.f32 -1.442695, %v255_v45 }
 0x3a4   :  { %2083 = vpow2.f32 %v1699_v50 }
 0x3ac   :  { %v2082_v49 = vpop.eup %2081 }
 0x3ad   :  { %265 = vrot.lane.b32.xlu0 %v2082_v49, %s2204_s29 }
 0x3ae   :  { %v2084_v51 = vpop.eup %2083 }
 0x3af   :  { %v259_v52 = vadd.f32 1.0, %v2084_v51 }
 0x3b1   :  { %2085 = vrcp.f32 %v259_v52 }
 0x3bb   :  { %v2086_v53 = vpop.eup %2085 }
 0x3bc   :  { %v263_v56 = vmul.f32 %v2086_v53, %v201_v37  ;;  %v114_v37 = vadd.f32 %v2319_v21, %v2314_v17 }
 0x41f   :  { %v266_v54 = vpop.permute.xlu0 %265 }
 0x420   :  { %v268_v55 = vmul.f32 %v2086_v53, %v266_v54 }
 0x422   :  { %270 = vrot.lane.b32.xlu1 %v268_v55, %s2205_s3 }
 0x494   :  { %v271_v57 = vpop.permute.xlu1 %270 }
 0x495   :  { %v273_v58 = vadd.f32 %v271_v57, %v263_v56 }
 0x497   :  { %2087 = vtanh.f32 %v273_v58 }
 0x4a1   :  { %v2088_v2 = vpop.eup %2087 }
 0x4a2   :  { %276 = vrot.lane.b32.xlu0 %v2088_v2, %s2204_s29 }
 0x514   :  { %v277_v3 = vpop.permute.xlu0 %276 }
 0x515   :  { %v279_v4 = vmul.f32 %v2086_v53, %v277_v3 }
 0x517   :  { %v280_v5 = vpack.c.bf16 %v279_v4, %v279_v4 }
 0x519   :  { %282 = vrot.lane.b32.xlu1 %v280_v5, %s2205_s3 }
 0x58b   :  { %v2364_v11 = vpop.permute.xlu1 %282 }
 0x58c   :  { %1849 = vmatmul.mubr.msk.bf16.vlgmr.msra.gmra.mrb[8].mxu0 %vm139_vm2, %v2364_v11 }
 0x58d   :  { %1861 = vmatpush3.bf16.msra.mxu0 %v2277_v8  ;;  %1864 = vmatprep.mubr.msk.bf16.mxu0 %vm2202_vm0, %v2201_v0 }
 0x58e   :  { %1862 = vmatprep.subr.bf16.mxu0 %v2201_v0 }
 0x591   :  { %1863 = vmatpush3.bf16.msra.mxu0 %v2292_v15 }
 0x592   :  { %1876 = vmatprep.subr.bf16.mxu0 %v2201_v0 }
 0x65f   :  { %v321_v13 = vpop.f32.mrb[8].mxu0 }
 0x660   :  { %v327_v14 = vadd.f32 %v321_v13, %v111_v12  ;;  %v1850_v19 = vpop.f32.mrb[9].mxu0 }
 0x661   :  { %v324_v20 = vpop.f32.mrb[10].mxu0 }
 0x662   :  { %2089 = vtanh.f32 %v327_v14  ;;  %v1851_v22 = vpop.f32.mrb[11].mxu0  ;;  %v1701_v24 = vmul.f32 -1.442695, %v327_v14 }
 0x664   :  { %2091 = vpow2.f32 %v1701_v24 }
 0x66c   :  { %v2090_v23 = vpop.eup %2089 }
 0x66d   :  { %337 = vrot.lane.b32.xlu0 %v2090_v23, %s2204_s29 }
 0x66e   :  { %v2092_v25 = vpop.eup %2091 }
 0x66f   :  { %v331_v26 = vadd.f32 1.0, %v2092_v25 }
 0x671   :  { %2093 = vrcp.f32 %v331_v26  ;;  %v122_v26 = vadd.f32 %v2314_v17, %v2362_v10 }
 0x67b   :  { %v2094_v27 = vpop.eup %2093 }
 0x67c   :  { %v335_v18 = vmul.f32 %v2094_v27, %v273_v58  ;;  %v119_v58 = vadd.f32 %v2314_v17, %v2358_v7 }
 0x6df   :  { %v338_v28 = vpop.permute.xlu0 %337 }
 0x6e0   :  { %v340_v29 = vmul.f32 %v2094_v27, %v338_v28 }
 0x6e2   :  { %342 = vrot.lane.b32.xlu1 %v340_v29, %s2205_s3 }
 0x754   :  { %v343_v30 = vpop.permute.xlu1 %342 }
 0x755   :  { %v345_v31 = vadd.f32 %v343_v30, %v335_v18 }
 0x757   :  { %2095 = vtanh.f32 %v345_v31 }
 0x761   :  { %v2096_v32 = vpop.eup %2095 }
 0x762   :  { %348 = vrot.lane.b32.xlu0 %v2096_v32, %s2204_s29 }
 0x7d4   :  { %v349_v33 = vpop.permute.xlu0 %348 }
 0x7d5   :  { %v351_v34 = vmul.f32 %v2094_v27, %v349_v33 }
 0x7d7   :  { %v352_v35 = vpack.c.bf16 %v351_v34, %v351_v34 }
 0x7d9   :  { %354 = vrot.lane.b32.xlu1 %v352_v35, %s2205_s3 }
 0x84b   :  { %v2380_v36 = vpop.permute.xlu1 %354 }
 0x84c   :  { %1857 = vmatmul.mubr.msk.bf16.vlgmr.msra.gmra.mrb[8].mxu1 %vm139_vm2, %v2380_v36 }
 0x84d   :  { %1869 = vmatpush3.bf16.msra.mxu1 %v2277_v8  ;;  %1872 = vmatprep.mubr.msk.bf16.mxu1 %vm2202_vm0, %v2201_v0 }
 0x84e   :  { %1870 = vmatprep.subr.bf16.mxu1 %v2201_v0 }
 0x851   :  { %1871 = vmatpush3.bf16.msra.mxu1 %v2292_v15 }
 0x852   :  { %1884 = vmatprep.subr.bf16.mxu1 %v2201_v0 }
 0x91f   :  { %v393_v38 = vpop.f32.mrb[8].mxu1 }
 0x920   :  { %v399_v39 = vadd.f32 %v393_v38, %v114_v37  ;;  %v1858_v40 = vpop.f32.mrb[9].mxu1 }
 0x921   :  { %v396_v41 = vpop.f32.mrb[10].mxu1 }
 0x922   :  { %2097 = vtanh.f32 %v399_v39  ;;  %v1859_v43 = vpop.f32.mrb[11].mxu1  ;;  %v1703_v45 = vmul.f32 -1.442695, %v399_v39 }
 0x924   :  { %2099 = vpow2.f32 %v1703_v45  ;;  %v713_v45 = vld [vmem:[%s2681_s4 + $0x8] sm:$0xff] }
 0x92c   :  { %v2098_v44 = vpop.eup %2097 }
 0x92d   :  { %409 = vrot.lane.b32.xlu0 %v2098_v44, %s2204_s29  ;;  %v712_v44 = vld [vmem:[%s2681_s4] sm:$0xff] }
 0x92e   :  { %v2100_v46 = vpop.eup %2099 }
 0x92f   :  { %v403_v47 = vadd.f32 1.0, %v2100_v46  ;;  %v2437_v46 = vpack.c.bf16 %v713_v45, %v712_v44 }
 0x931   :  { %2101 = vrcp.f32 %v403_v47  ;;  %v714_v47 = vld [vmem:[%s2681_s4 + $0x10] sm:$0xff] }
 0x93b   :  { %v2102_v48 = vpop.eup %2101 }
 0x93c   :  { %v407_v21 = vmul.f32 %v2102_v48, %v345_v31 }
 0x99f   :  { %v410_v49 = vpop.permute.xlu0 %409 }
 0x9a0   :  { %v412_v50 = vmul.f32 %v2102_v48, %v410_v49 }
 0x9a2   :  { %414 = vrot.lane.b32.xlu1 %v412_v50, %s2205_s3 }
 0xa14   :  { %v415_v51 = vpop.permute.xlu1 %414 }
 0xa15   :  { %v417_v52 = vadd.f32 %v415_v51, %v407_v21  ;;  %v718_v21 = vld [vmem:[%s2682_s5] sm:$0xff]  ;;  %v719_v51 = vld [vmem:[%s2682_s5 + $0x8] sm:$0xff] }
 0xa17   :  { %2103 = vtanh.f32 %v417_v52 }
 0xa21   :  { %v2104_v53 = vpop.eup %2103 }
 0xa22   :  { %420 = vrot.lane.b32.xlu0 %v2104_v53, %s2204_s29  ;;  %v720_v53 = vld [vmem:[%s2682_s5 + $0x10] sm:$0xff] }
 0xa94   :  { %v421_v54 = vpop.permute.xlu0 %420 }
 0xa95   :  { %v423_v55 = vmul.f32 %v2102_v48, %v421_v54  ;;  %v715_v48 = vld [vmem:[%s2681_s4 + $0x18] sm:$0xff] }
 0xa96   :  { %v2450_v50 = vpack.c.bf16 %v715_v48, %v714_v47  ;;  %v721_v54 = vld [vmem:[%s2682_s5 + $0x18] sm:$0xff] }
 0xa97   :  { %v424_v56 = vpack.c.bf16 %v423_v55, %v423_v55  ;;  %v2474_v55 = vpack.c.bf16 %v721_v54, %v720_v53 }
 0xa99   :  { %426 = vrot.lane.b32.xlu1 %v424_v56, %s2205_s3 }
 0xb0b   :  { %v2396_v57 = vpop.permute.xlu1 %426 }
 0xb0c   :  { %1865 = vmatmul.mubr.msk.bf16.vlgmr.msra.gmra.mrb[12].mxu0 %vm139_vm2, %v2396_v57 }
 0xb0d   :  { %1877 = vmatpush3.bf16.msra.mxu0 %v2277_v8  ;;  %1880 = vmatprep.mubr.msk.bf16.mxu0 %vm2202_vm0, %v2201_v0 }
 0xb0e   :  { %1878 = vmatprep.subr.bf16.mxu0 %v2201_v0 }
 0xb11   :  { %1879 = vmatpush3.bf16.msra.mxu0 %v2292_v15 }
 0xb12   :  { %1892 = vmatprep.subr.bf16.mxu0 %v2201_v0 }
 0xbdf   :  { %v465_v59 = vpop.f32.mrb[12].mxu0 }
 0xbe0   :  { %v471_v60 = vadd.f32 %v465_v59, %v119_v58  ;;  %v1866_v61 = vpop.f32.mrb[13].mxu0 }
 0xbe1   :  { %v468_v62 = vpop.f32.mrb[14].mxu0  ;;  %v2502_v61 = vld [vmem:[%s2683_s6] ss:$0 sm:$0xff] }
 0xbe2   :  { %2105 = vtanh.f32 %v471_v60  ;;  %v1867_v63 = vpop.f32.mrb[15].mxu0  ;;  %v1705_v2 = vmul.f32 -1.442695, %v471_v60 }
 0xbe4   :  { %2107 = vpow2.f32 %v1705_v2 }
 0xbec   :  { %v2106_v1 = vpop.eup %2105 }
 0xbed   :  { %481 = vrot.lane.b32.xlu0 %v2106_v1, %s2204_s29 }
 0xbee   :  { %v2108_v3 = vpop.eup %2107 }
 0xbef   :  { %v475_v4 = vadd.f32 1.0, %v2108_v3 }
 0xbf1   :  { %2109 = vrcp.f32 %v475_v4 }
 0xbfb   :  { %v2110_v5 = vpop.eup %2109 }
 0xbfc   :  { %v479_v7 = vmul.f32 %v2110_v5, %v417_v52  ;;  %v2462_v52 = vpack.c.bf16 %v719_v51, %v718_v21 }
 0xc5f   :  { %v482_v12 = vpop.permute.xlu0 %481 }
 0xc60   :  { %v484_v13 = vmul.f32 %v2110_v5, %v482_v12 }
 0xc62   :  { %486 = vrot.lane.b32.xlu1 %v484_v13, %s2205_s3 }
 0xcd4   :  { %v487_v14 = vpop.permute.xlu1 %486 }
 0xcd5   :  { %v489_v19 = vadd.f32 %v487_v14, %v479_v7 }
 0xcd7   :  { %2111 = vtanh.f32 %v489_v19 }
 0xce1   :  { %v2112_v20 = vpop.eup %2111 }
 0xce2   :  { %492 = vrot.lane.b32.xlu0 %v2112_v20, %s2204_s29 }
 0xd54   :  { %v493_v22 = vpop.permute.xlu0 %492 }
 0xd55   :  { %v495_v23 = vmul.f32 %v2110_v5, %v493_v22 }
 0xd57   :  { %v496_v24 = vpack.c.bf16 %v495_v23, %v495_v23 }
 0xd59   :  { %498 = vrot.lane.b32.xlu1 %v496_v24, %s2205_s3 }
 0xdcb   :  { %v2412_v25 = vpop.permute.xlu1 %498 }
 0xdcc   :  { %1873 = vmatmul.mubr.msk.bf16.vlgmr.msra.gmra.mrb[12].mxu1 %vm139_vm2, %v2412_v25 }
 0xdcd   :  { %1885 = vmatpush3.bf16.msra.mxu1 %v2277_v8  ;;  %1888 = vmatprep.mubr.msk.bf16.mxu1 %vm2202_vm0, %v2201_v0 }
 0xdce   :  { %1886 = vmatprep.subr.bf16.mxu1 %v2201_v0 }
 0xdd1   :  { %1887 = vmatpush3.bf16.msra.mxu1 %v2292_v15 }
 0xdd2   :  { %1908 = vmatprep.subr.bf16.mxu1 %v2201_v0 }
 0xe9f   :  { %v537_v27 = vpop.f32.mrb[12].mxu1 }
 0xea0   :  { %v543_v28 = vadd.f32 %v537_v27, %v122_v26  ;;  %v1874_v29 = vpop.f32.mrb[13].mxu1 }
 0xea1   :  { %v540_v18 = vpop.f32.mrb[14].mxu1 }
 0xea2   :  { %2113 = vtanh.f32 %v543_v28  ;;  %v1875_v30 = vpop.f32.mrb[15].mxu1  ;;  %v1707_v8 = vmul.f32 -1.442695, %v543_v28 }
 0xea4   :  { %2115 = vpow2.f32 %v1707_v8 }
 0xeac   :  { %v2114_v31 = vpop.eup %2113 }
 0xead   :  { %553 = vrot.lane.b32.xlu0 %v2114_v31, %s2204_s29 }
 0xeae   :  { %v2116_v32 = vpop.eup %2115 }
 0xeaf   :  { %v547_v33 = vadd.f32 1.0, %v2116_v32 }
 0xeb1   :  { %2117 = vrcp.f32 %v547_v33 }
 0xebb   :  { %v2118_v15 = vpop.eup %2117 }
 0xebc   :  { %v551_v10 = vmul.f32 %v2118_v15, %v489_v19 }
 0xf1f   :  { %v554_v34 = vpop.permute.xlu0 %553 }
 0xf20   :  { %v556_v35 = vmul.f32 %v2118_v15, %v554_v34 }
 0xf22   :  { %558 = vrot.lane.b32.xlu1 %v556_v35, %s2205_s3 }
 0xf94   :  { %v559_v37 = vpop.permute.xlu1 %558 }
 0xf95   :  { %v2426_v38 = vadd.f32 %v559_v37, %v551_v10 }
 0xf97   :  { %2119 = vtanh.f32 %v2426_v38 }
 0xfa1   :  { %v2120_v39 = vpop.eup %2119 }
 0xfa2   :  { %564 = vrot.lane.b32.xlu0 %v2120_v39, %s2204_s29 }
0x1014   :  { %v565_v40 = vpop.permute.xlu0 %564 }
0x1015   :  { %v567_v41 = vmul.f32 %v2118_v15, %v565_v40 }
0x1017   :  { %v568_v43 = vpack.c.bf16 %v567_v41, %v567_v41 }
0x1019   :  { %570 = vrot.lane.b32.xlu1 %v568_v43, %s2205_s3 }
0x108b   :  { %v2445_v49 = vpop.permute.xlu1 %570 }
0x108c   :  { %1881 = vmatmul.mubr.msk.bf16.vlgmr.msra.gmra.mrb[16].mxu0 %vm139_vm2, %v2445_v49 }
0x108d   :  { %1893 = vmatpush3.bf16.msra.mxu0 %v2437_v46  ;;  %1896 = vmatprep.mubr.msk.bf16.mxu0 %vm2202_vm0, %v2201_v0 }
0x108e   :  { %1894 = vmatprep.subr.bf16.mxu0 %v2201_v0 }
0x1091   :  { %1895 = vmatpush3.bf16.msra.mxu0 %v2450_v50 }
0x1092   :  { %1900 = vmatprep.subr.bf16.mxu0 %v2201_v0 }
0x1094   :  { %1897 = vmatmul.mubr.msk.bf16.vlgmr.msra.gmra.mrb[20].mxu0 %vm139_vm2, %v2325_v42 }
0x1095   :  { %1901 = vmatpush3.bf16.msra.mxu0 %v2462_v52  ;;  %1904 = vmatprep.mubr.msk.bf16.mxu0 %vm2202_vm0, %v2201_v0 }
0x1096   :  { %1902 = vmatprep.subr.bf16.mxu0 %v2201_v0 }
0x1099   :  { %1903 = vmatpush3.bf16.msra.mxu0 %v2474_v55 }
0x109a   :  { %1924 = vmatprep.subr.bf16.mxu0 %v2201_v0 }
0x10a0   :  { %1905 = vmatmul.mubr.bf16.vlgmr.msra.gmra.mrb[20].mxu0 %v2203_v16  ;;  %v127_v16 = vadd.f32 %v2356_v6, %v2314_v17 }
0x10a1   :  { %1925 = vmatpush3.bf16.msra.mxu0 %v2437_v46  ;;  %1928 = vmatprep.mubr.msk.bf16.mxu0 %vm2202_vm0, %v2201_v0 }
0x10a2   :  { %1926 = vmatprep.subr.bf16.mxu0 %v2201_v0 }
0x10a5   :  { %1927 = vmatpush3.bf16.msra.mxu0 %v2450_v50 }
0x10a6   :  { %1932 = vmatprep.subr.bf16.mxu0 %v2201_v0 }
0x10a8   :  { %1929 = vmatmul.mubr.msk.bf16.vlgmr.msra.gmra.mrb[24].mxu0 %vm139_vm2, %v2380_v36 }
0x10a9   :  { %1933 = vmatpush3.bf16.msra.mxu0 %v2462_v52  ;;  %1936 = vmatprep.mubr.msk.bf16.mxu0 %vm2202_vm0, %v2201_v0 }
0x10aa   :  { %1934 = vmatprep.subr.bf16.mxu0 %v2201_v0 }
0x10ad   :  { %1935 = vmatpush3.bf16.msra.mxu0 %v2474_v55 }
0x10ae   :  { %1956 = vmatprep.subr.bf16.mxu0 %v2201_v0 }
0x115f   :  { %v609_v42 = vpop.f32.mrb[16].mxu0 }
0x1160   :  { %v615_v56 = vadd.f32 %v609_v42, %v127_v16  ;;  %v1882_v58 = vpop.f32.mrb[17].mxu0 }
0x1161   :  { %v612_v59 = vpop.f32.mrb[18].mxu0 }
0x1162   :  { %2121 = vtanh.f32 %v615_v56  ;;  %v1883_v36 = vpop.f32.mrb[19].mxu0  ;;  %v1709_v4 = vmul.f32 -1.442695, %v615_v56 }
0x116c   :  { %v2122_v60 = vpop.eup %2121 }
0x116d   :  { %625 = vrot.lane.b32.xlu0 %v2122_v60, %s2204_s29 }
0x1173   :  { %v805_v62 = vpop.f32.mrb[20].mxu0 }
0x1174   :  { %v2028_v63 = vadd.f32 %v2502_v61, %v805_v62  ;;  %v1906_v1 = vpop.f32.mrb[21].mxu0 }
0x1175   :  { %v808_v2 = vpop.f32.mrb[22].mxu0 }
0x1176   :  { %2123 = vtanh.f32 %v2028_v63  ;;  %v1907_v6 = vpop.f32.mrb[23].mxu0  ;;  %v1714_v13 = vmul.f32 -1.442695, %v2028_v63 }
0x1177   :  { %2125 = vpow2.f32 %v1709_v4 }
0x1180   :  { %v2124_v3 = vpop.eup %2123 }
0x1181   :  { %821 = vrot.lane.b32.xlu1 %v2124_v3, %s2204_s29  ;;  %v2126_v5 = vpop.eup %2125 }
0x1182   :  { %v619_v12 = vadd.f32 1.0, %v2126_v5 }
0x1184   :  { %2127 = vrcp.f32 %v619_v12 }
0x1185   :  { %2129 = vpow2.f32 %v1714_v13 }
0x118e   :  { %v2128_v7 = vpop.eup %2127 }
0x118f   :  { %v2130_v20 = vpop.eup %2129  ;;  %v623_v27 = vmul.f32 %v2128_v7, %v2426_v38 }
0x1190   :  { %v815_v22 = vadd.f32 1.0, %v2130_v20 }
0x1192   :  { %2131 = vrcp.f32 %v815_v22 }
0x119c   :  { %v2132_v23 = vpop.eup %2131 }
0x119d   :  { %v819_v30 = vmul.f32 0.0, %v2132_v23 }
0x11df   :  { %v626_v14 = vpop.permute.xlu0 %625 }
0x11e0   :  { %v628_v19 = vmul.f32 %v2128_v7, %v626_v14 }
0x11e2   :  { %630 = vrot.lane.b32.xlu0 %v628_v19, %s2205_s3 }
0x11f3   :  { %v822_v24 = vpop.permute.xlu1 %821 }
0x11f4   :  { %v824_v26 = vmul.f32 %v2132_v23, %v822_v24 }
0x11f6   :  { %826 = vrot.lane.b32.xlu1 %v824_v26, %s2205_s3 }
0x1254   :  { %v631_v28 = vpop.permute.xlu0 %630 }
0x1255   :  { %v2509_v29 = vadd.f32 %v631_v28, %v623_v27 }
0x1257   :  { %2133 = vtanh.f32 %v2509_v29 }
0x1261   :  { %v2134_v18 = vpop.eup %2133 }
0x1262   :  { %636 = vrot.lane.b32.xlu0 %v2134_v18, %s2204_s29 }
0x1268   :  { %v827_v31 = vpop.permute.xlu1 %826 }
0x1269   :  { %v829_v8 = vadd.f32 %v827_v31, %v819_v30 }
0x126b   :  { %2135 = vtanh.f32 %v829_v8 }
0x1275   :  { %v2136_v32 = vpop.eup %2135 }
0x1276   :  { %832 = vrot.lane.b32.xlu1 %v2136_v32, %s2204_s29 }
0x12d4   :  { %v637_v33 = vpop.permute.xlu0 %636 }
0x12d5   :  { %v639_v15 = vmul.f32 %v2128_v7, %v637_v33 }
0x12d7   :  { %v640_v34 = vpack.c.bf16 %v639_v15, %v639_v15 }
0x12d9   :  { %642 = vrot.lane.b32.xlu0 %v640_v34, %s2205_s3 }
0x12e8   :  { %v833_v35 = vpop.permute.xlu1 %832 }
0x12e9   :  { %v835_v10 = vmul.f32 %v2132_v23, %v833_v35 }
0x12eb   :  { %v876_v37 = vpack.c.bf16 %v835_v10, %v835_v10 }
0x12ed   :  { %878 = vrot.lane.b32.xlu1 %v876_v37, %s2205_s3 }
0x134b   :  { %v2516_v38 = vpop.permute.xlu0 %642 }
0x134c   :  { %1889 = vmatmul.mubr.msk.bf16.vlgmr.msra.gmra.mrb[16].mxu1 %vm139_vm2, %v2516_v38 }
0x134d   :  { %1909 = vmatpush3.bf16.msra.mxu1 %v2437_v46  ;;  %1912 = vmatprep.mubr.msk.bf16.mxu1 %vm2202_vm0, %v2201_v0 }
0x134e   :  { %1910 = vmatprep.subr.bf16.mxu1 %v2201_v0 }
0x1351   :  { %1911 = vmatpush3.bf16.msra.mxu1 %v2450_v50 }
0x1352   :  { %1916 = vmatprep.subr.bf16.mxu1 %v2201_v0 }
0x1354   :  { %1913 = vmatmul.mubr.msk.bf16.vlgmr.msra.gmra.mrb[20].mxu1 %vm139_vm2, %v2364_v11  ;;  %v130_v11 = vadd.f32 %v2360_v9, %v2314_v17 }
0x1355   :  { %1917 = vmatpush3.bf16.msra.mxu1 %v2462_v52  ;;  %1920 = vmatprep.mubr.msk.bf16.mxu1 %vm2202_vm0, %v2201_v0 }
0x1356   :  { %1918 = vmatprep.subr.bf16.mxu1 %v2201_v0 }
0x1359   :  { %1919 = vmatpush3.bf16.msra.mxu1 %v2474_v55 }
0x135a   :  { %1940 = vmatprep.subr.bf16.mxu1 %v2201_v0 }
0x135f   :  { %v879_v39 = vpop.permute.xlu1 %878 }
0x1360   :  { %1921 = vmatmul.mubr.msk.bf16.vlgmr.msra.gmra.mrb[20].mxu1 %vm139_vm2, %v879_v39 }
0x1361   :  { %1941 = vmatpush3.bf16.msra.mxu1 %v2437_v46  ;;  %1944 = vmatprep.mubr.msk.bf16.mxu1 %vm2202_vm0, %v2201_v0 }
0x1362   :  { %1942 = vmatprep.subr.bf16.mxu1 %v2201_v0 }
0x1365   :  { %1943 = vmatpush3.bf16.msra.mxu1 %v2450_v50 }
0x1366   :  { %1948 = vmatprep.subr.bf16.mxu1 %v2201_v0 }
0x1368   :  { %1945 = vmatmul.mubr.msk.bf16.vlgmr.msra.gmra.mrb[24].mxu1 %vm139_vm2, %v2396_v57 }
0x1369   :  { %1949 = vmatpush3.bf16.msra.mxu1 %v2462_v52  ;;  %1952 = vmatprep.mubr.msk.bf16.mxu1 %vm2202_vm0, %v2201_v0 }
0x136a   :  { %1950 = vmatprep.subr.bf16.mxu1 %v2201_v0 }
0x136d   :  { %1951 = vmatpush3.bf16.msra.mxu1 %v2474_v55 }
0x136e   :  { %1972 = vmatprep.subr.bf16.mxu1 %v2201_v0 }
0x141f   :  { %v681_v40 = vpop.f32.mrb[16].mxu1 }
0x1420   :  { %v2551_v41 = vadd.f32 %v681_v40, %v130_v11  ;;  %v1890_v43 = vpop.f32.mrb[17].mxu1 }
0x1421   :  { %v684_v44 = vpop.f32.mrb[18].mxu1 }
0x1422   :  { %v1891_v57 = vpop.f32.mrb[19].mxu1 }
0x1433   :  { %v917_v45 = vpop.f32.mrb[20].mxu1 }
0x1434   :  { %v2029_v47 = vadd.f32 %v2502_v61, %v917_v45  ;;  %v1922_v48 = vpop.f32.mrb[21].mxu1 }
0x1435   :  { %v920_v21 = vpop.f32.mrb[22].mxu1 }
0x1436   :  { %2137 = vtanh.f32 %v2029_v47  ;;  %v1923_v51 = vpop.f32.mrb[23].mxu1  ;;  %v1717_v54 = vmul.f32 -1.442695, %v2029_v47 }
0x1438   :  { %2139 = vpow2.f32 %v1717_v54 }
0x1440   :  { %v2138_v53 = vpop.eup %2137 }
0x1441   :  { %933 = vrot.lane.b32.xlu0 %v2138_v53, %s2204_s29 }
0x1442   :  { %v2140_v16 = vpop.eup %2139 }
0x1443   :  { %v927_v17 = vadd.f32 1.0, %v2140_v16 }
0x1445   :  { %2141 = vrcp.f32 %v927_v17 }
0x144f   :  { %v2142_v9 = vpop.eup %2141 }
0x1450   :  { %v931_v58 = vmul.f32 %v2142_v9, %v829_v8 }
0x14b3   :  { %v934_v42 = vpop.permute.xlu0 %933 }
0x14b4   :  { %v936_v56 = vmul.f32 %v2142_v9, %v934_v42 }
0x14b6   :  { %938 = vrot.lane.b32.xlu1 %v936_v56, %s2205_s3 }
0x1528   :  { %v939_v59 = vpop.permute.xlu1 %938 }
0x1529   :  { %v941_v36 = vadd.f32 %v939_v59, %v931_v58 }
0x152b   :  { %2143 = vtanh.f32 %v941_v36 }
0x1535   :  { %v2144_v60 = vpop.eup %2143 }
0x1536   :  { %944 = vrot.lane.b32.xlu0 %v2144_v60, %s2204_s29 }
0x15a8   :  { %v945_v62 = vpop.permute.xlu0 %944 }
0x15a9   :  { %v947_v63 = vmul.f32 %v2142_v9, %v945_v62 }
0x15ab   :  { %v988_v1 = vpack.c.bf16 %v947_v63, %v947_v63 }
0x15ad   :  { %990 = vrot.lane.b32.xlu1 %v988_v1, %s2205_s3 }
0x161f   :  { %v991_v2 = vpop.permute.xlu1 %990 }
0x1620   :  { %1937 = vmatmul.mubr.msk.bf16.vlgmr.msra.gmra.mrb[24].mxu0 %vm139_vm2, %v991_v2 }
0x1621   :  { %1957 = vmatpush3.bf16.msra.mxu0 %v2437_v46  ;;  %1960 = vmatprep.mubr.msk.bf16.mxu0 %vm2202_vm0, %v2201_v0 }
0x1622   :  { %1958 = vmatprep.subr.bf16.mxu0 %v2201_v0 }
0x1625   :  { %1959 = vmatpush3.bf16.msra.mxu0 %v2450_v50 }
0x1626   :  { %1964 = vmatprep.subr.bf16.mxu0 %v2201_v0 }
0x1628   :  { %1961 = vmatmul.mubr.msk.bf16.vlgmr.msra.gmra.mrb[28].mxu0 %vm139_vm2, %v2412_v25 }
0x1629   :  { %1965 = vmatpush3.bf16.msra.mxu0 %v2462_v52  ;;  %1968 = vmatprep.mubr.msk.bf16.mxu0 %vm2202_vm0, %v2201_v0 }
0x162a   :  { %1966 = vmatprep.subr.bf16.mxu0 %v2201_v0 }
0x162d   :  { %1967 = vmatpush3.bf16.msra.mxu0 %v2474_v55 }
0x162e   :  { %1988 = vmatprep.subr.bf16.mxu0 %v2201_v0 }
0x16f3   :  { %v1029_v6 = vpop.f32.mrb[24].mxu0 }
0x16f4   :  { %v2030_v3 = vadd.f32 %v2502_v61, %v1029_v6  ;;  %v1938_v4 = vpop.f32.mrb[25].mxu0 }
0x16f5   :  { %v1032_v5 = vpop.f32.mrb[26].mxu0 }
0x16f6   :  { %2145 = vtanh.f32 %v2030_v3  ;;  %v1939_v12 = vpop.f32.mrb[27].mxu0  ;;  %v1720_v25 = vmul.f32 -1.442695, %v2030_v3 }
0x16f8   :  { %2147 = vpow2.f32 %v1720_v25 }
0x1700   :  { %v2146_v13 = vpop.eup %2145 }
0x1701   :  { %1045 = vrot.lane.b32.xlu0 %v2146_v13, %s2204_s29 }
0x1702   :  { %v2148_v7 = vpop.eup %2147 }
0x1703   :  { %v1039_v14 = vadd.f32 1.0, %v2148_v7 }
0x1705   :  { %2149 = vrcp.f32 %v1039_v14 }
0x170f   :  { %v2150_v19 = vpop.eup %2149 }
0x1710   :  { %v1043_v23 = vmul.f32 %v2150_v19, %v941_v36 }
0x1773   :  { %v1046_v20 = vpop.permute.xlu0 %1045 }
0x1774   :  { %v1048_v22 = vmul.f32 %v2150_v19, %v1046_v20 }
0x1776   :  { %1050 = vrot.lane.b32.xlu1 %v1048_v22, %s2205_s3 }
0x17e8   :  { %v1051_v24 = vpop.permute.xlu1 %1050 }
0x17e9   :  { %v1053_v26 = vadd.f32 %v1051_v24, %v1043_v23 }
0x17eb   :  { %2151 = vtanh.f32 %v1053_v26 }
0x17f5   :  { %v2152_v27 = vpop.eup %2151 }
0x17f6   :  { %1056 = vrot.lane.b32.xlu0 %v2152_v27, %s2204_s29 }
0x1868   :  { %v1057_v28 = vpop.permute.xlu0 %1056 }
0x1869   :  { %v1059_v18 = vmul.f32 %v2150_v19, %v1057_v28 }
0x186b   :  { %v1100_v30 = vpack.c.bf16 %v1059_v18, %v1059_v18 }
0x186d   :  { %1102 = vrot.lane.b32.xlu1 %v1100_v30, %s2205_s3 }
0x18df   :  { %v1103_v31 = vpop.permute.xlu1 %1102 }
0x18e0   :  { %1953 = vmatmul.mubr.msk.bf16.vlgmr.msra.gmra.mrb[24].mxu1 %vm139_vm2, %v1103_v31  ;;  %v1711_v31 = vmul.f32 -1.442695, %v2551_v41 }
0x18e1   :  { %1973 = vmatpush3.bf16.msra.mxu1 %v2437_v46  ;;  %1976 = vmatprep.mubr.msk.bf16.mxu1 %vm2202_vm0, %v2201_v0 }
0x18e2   :  { %1974 = vmatprep.subr.bf16.mxu1 %v2201_v0 }
0x18e5   :  { %1975 = vmatpush3.bf16.msra.mxu1 %v2450_v50 }
0x18e6   :  { %1980 = vmatprep.subr.bf16.mxu1 %v2201_v0 }
0x18e8   :  { %1977 = vmatmul.mubr.msk.bf16.vlgmr.msra.gmra.mrb[28].mxu1 %vm139_vm2, %v2445_v49 }
0x18e9   :  { %1981 = vmatpush3.bf16.msra.mxu1 %v2462_v52  ;;  %1984 = vmatprep.mubr.msk.bf16.mxu1 %vm2202_vm0, %v2201_v0 }
0x18ea   :  { %1982 = vmatprep.subr.bf16.mxu1 %v2201_v0 }
0x18ed   :  { %1983 = vmatpush3.bf16.msra.mxu1 %v2474_v55 }
0x18ee   :  { %2004 = vmatprep.subr.bf16.mxu1 %v2201_v0 }
0x19b3   :  { %v1141_v8 = vpop.f32.mrb[24].mxu1 }
0x19b4   :  { %v2031_v32 = vadd.f32 %v2502_v61, %v1141_v8  ;;  %v1954_v33 = vpop.f32.mrb[25].mxu1 }
0x19b5   :  { %v1144_v15 = vpop.f32.mrb[26].mxu1 }
0x19b6   :  { %2153 = vtanh.f32 %v2031_v32  ;;  %v1955_v34 = vpop.f32.mrb[27].mxu1  ;;  %v1723_v49 = vmul.f32 -1.442695, %v2031_v32 }
0x19b8   :  { %2155 = vpow2.f32 %v1723_v49 }
0x19c0   :  { %v2154_v35 = vpop.eup %2153 }
0x19c1   :  { %1157 = vrot.lane.b32.xlu0 %v2154_v35, %s2204_s29 }
0x19c2   :  { %v2156_v10 = vpop.eup %2155 }
0x19c3   :  { %v1151_v37 = vadd.f32 1.0, %v2156_v10 }
0x19c5   :  { %2157 = vrcp.f32 %v1151_v37 }
0x19cf   :  { %v2158_v39 = vpop.eup %2157 }
0x19d0   :  { %v1155_v43 = vmul.f32 %v2158_v39, %v1053_v26 }
0x1a33   :  { %v1158_v11 = vpop.permute.xlu0 %1157 }
0x1a34   :  { %v1160_v40 = vmul.f32 %v2158_v39, %v1158_v11 }
0x1a36   :  { %1162 = vrot.lane.b32.xlu1 %v1160_v40, %s2205_s3 }
0x1aa8   :  { %v1163_v44 = vpop.permute.xlu1 %1162 }
0x1aa9   :  { %v1165_v57 = vadd.f32 %v1163_v44, %v1155_v43 }
0x1aab   :  { %2159 = vtanh.f32 %v1165_v57 }
0x1ab5   :  { %v2160_v45 = vpop.eup %2159 }
0x1ab6   :  { %1168 = vrot.lane.b32.xlu0 %v2160_v45, %s2204_s29 }
0x1b28   :  { %v1169_v47 = vpop.permute.xlu0 %1168 }
0x1b29   :  { %v1171_v48 = vmul.f32 %v2158_v39, %v1169_v47 }
0x1b2b   :  { %v1212_v21 = vpack.c.bf16 %v1171_v48, %v1171_v48 }
0x1b2d   :  { %1214 = vrot.lane.b32.xlu1 %v1212_v21, %s2205_s3 }
0x1b9f   :  { %v1215_v51 = vpop.permute.xlu1 %1214 }
0x1ba0   :  { %1969 = vmatmul.mubr.msk.bf16.vlgmr.msra.gmra.mrb[28].mxu0 %vm139_vm2, %v1215_v51 }
0x1ba1   :  { %1989 = vmatpush3.bf16.msra.mxu0 %v2437_v46  ;;  %1992 = vmatprep.mubr.msk.bf16.mxu0 %vm2202_vm0, %v2201_v0 }
0x1ba2   :  { %1990 = vmatprep.subr.bf16.mxu0 %v2201_v0 }
0x1ba5   :  { %1991 = vmatpush3.bf16.msra.mxu0 %v2450_v50 }
0x1ba6   :  { %1996 = vmatprep.subr.bf16.mxu0 %v2201_v0 }
0x1ba8   :  { %1993 = vmatmul.mubr.msk.bf16.vlgmr.msra.gmra.mrb[32].mxu0 %vm139_vm2, %v2516_v38 }
0x1ba9   :  { %1997 = vmatpush3.bf16.msra.mxu0 %v2462_v52  ;;  %2000 = vmatprep.mubr.msk.bf16.mxu0 %vm2202_vm0, %v2201_v0 }
0x1baa   :  { %1998 = vmatprep.subr.bf16.mxu0 %v2201_v0 }
0x1bad   :  { %1999 = vmatpush3.bf16.msra.mxu0 %v2474_v55 }
0x1bae   :  { %2020 = vmatprep.subr.bf16.mxu0 %v2201_v0 }
0x1c73   :  { %v1253_v53 = vpop.f32.mrb[28].mxu0 }
0x1c74   :  { %v2032_v54 = vadd.f32 %v2502_v61, %v1253_v53  ;;  %v1970_v16 = vpop.f32.mrb[29].mxu0 }
0x1c75   :  { %v1256_v17 = vpop.f32.mrb[30].mxu0 }
0x1c76   :  { %2161 = vtanh.f32 %v2032_v54  ;;  %v1971_v9 = vpop.f32.mrb[31].mxu0  ;;  %v1726_v38 = vmul.f32 -1.442695, %v2032_v54 }
0x1c78   :  { %2163 = vpow2.f32 %v1726_v38 }
0x1c80   :  { %v2162_v42 = vpop.eup %2161 }
0x1c81   :  { %1269 = vrot.lane.b32.xlu0 %v2162_v42, %s2204_s29 }
0x1c82   :  { %v2164_v56 = vpop.eup %2163 }
0x1c83   :  { %v1263_v58 = vadd.f32 1.0, %v2164_v56 }
0x1c85   :  { %2165 = vrcp.f32 %v1263_v58 }
0x1c8f   :  { %v2166_v59 = vpop.eup %2165 }
0x1c90   :  { %v1267_v62 = vmul.f32 %v2166_v59, %v1165_v57 }
0x1cf3   :  { %v1270_v36 = vpop.permute.xlu0 %1269 }
0x1cf4   :  { %v1272_v60 = vmul.f32 %v2166_v59, %v1270_v36 }
0x1cf6   :  { %1274 = vrot.lane.b32.xlu1 %v1272_v60, %s2205_s3 }
0x1d68   :  { %v1275_v63 = vpop.permute.xlu1 %1274 }
0x1d69   :  { %v1277_v1 = vadd.f32 %v1275_v63, %v1267_v62 }
0x1d6b   :  { %2167 = vtanh.f32 %v1277_v1 }
0x1d75   :  { %v2168_v2 = vpop.eup %2167 }
0x1d76   :  { %1280 = vrot.lane.b32.xlu0 %v2168_v2, %s2204_s29 }
0x1de8   :  { %v1281_v6 = vpop.permute.xlu0 %1280 }
0x1de9   :  { %v1283_v3 = vmul.f32 %v2166_v59, %v1281_v6 }
0x1deb   :  { %v1324_v4 = vpack.c.bf16 %v1283_v3, %v1283_v3 }
0x1ded   :  { %1326 = vrot.lane.b32.xlu1 %v1324_v4, %s2205_s3 }
0x1e5f   :  { %v1327_v5 = vpop.permute.xlu1 %1326 }
0x1e60   :  { %1985 = vmatmul.mubr.msk.bf16.vlgmr.msra.gmra.mrb[28].mxu1 %vm139_vm2, %v1327_v5 }
0x1e61   :  { %2005 = vmatpush3.bf16.msra.mxu1 %v2437_v46  ;;  %2008 = vmatprep.mubr.msk.bf16.mxu1 %vm2202_vm0, %v2201_v0 }
0x1e62   :  { %2006 = vmatprep.subr.bf16.mxu1 %v2201_v0 }
0x1e65   :  { %2007 = vmatpush3.bf16.msra.mxu1 %v2450_v50 }
0x1e66   :  { %2012 = vmatprep.subr.bf16.mxu1 %v2201_v0 }
0x1f33   :  { %v1365_v12 = vpop.f32.mrb[28].mxu1 }
0x1f34   :  { %v2033_v13 = vadd.f32 %v2502_v61, %v1365_v12  ;;  %v1986_v25 = vpop.f32.mrb[29].mxu1 }
0x1f35   :  { %v1368_v7 = vpop.f32.mrb[30].mxu1 }
0x1f36   :  { %2169 = vtanh.f32 %v2033_v13  ;;  %v1987_v14 = vpop.f32.mrb[31].mxu1  ;;  %v1729_v46 = vmul.f32 -1.442695, %v2033_v13 }
0x1f38   :  { %2171 = vpow2.f32 %v1729_v46 }
0x1f40   :  { %v2170_v19 = vpop.eup %2169 }
0x1f41   :  { %1381 = vrot.lane.b32.xlu0 %v2170_v19, %s2204_s29 }
0x1f42   :  { %v2172_v20 = vpop.eup %2171 }
0x1f43   :  { %v1375_v22 = vadd.f32 1.0, %v2172_v20  ;;  %v1627_v20 = vld [vmem:[%s2684_s7] sm:$0xff] }
0x1f45   :  { %2173 = vrcp.f32 %v1375_v22  ;;  %v1628_v22 = vld [vmem:[%s2684_s7 + $0x8] sm:$0xff] }
0x1f4f   :  { %v2174_v23 = vpop.eup %2173 }
0x1f50   :  { %v1379_v26 = vmul.f32 %v2174_v23, %v1277_v1 }
0x1fb3   :  { %v1382_v24 = vpop.permute.xlu0 %1381 }
0x1fb4   :  { %v1384_v50 = vmul.f32 %v2174_v23, %v1382_v24  ;;  %v1632_v24 = vpack.c.bf16 %v1628_v22, %v1627_v20 }
0x1fb6   :  { %1386 = vrot.lane.b32.xlu1 %v1384_v50, %s2205_s3  ;;  %v1630_v50 = vld [vmem:[%s2684_s7 + $0x18] sm:$0xff] }
0x2028   :  { %v1387_v27 = vpop.permute.xlu1 %1386 }
0x2029   :  { %v1389_v28 = vadd.f32 %v1387_v27, %v1379_v26 }
0x202b   :  { %2175 = vtanh.f32 %v1389_v28 }
0x202c   :  { %2177 = vtanh.f32 %v2551_v41 }
0x202d   :  { %2179 = vpow2.f32 %v1711_v31 }
0x2035   :  { %v2176_v18 = vpop.eup %2175 }
0x2036   :  { %1392 = vrot.lane.b32.xlu0 %v2176_v18, %s2204_s29  ;;  %v2178_v30 = vpop.eup %2177 }
0x2037   :  { %v2180_v8 = vpop.eup %2179 }
0x2038   :  { %v691_v32 = vadd.f32 1.0, %v2180_v8  ;;  %v1736_v8 = vld [vmem:[%s2685_s8] ss:$0 sm:$0xff] }
0x203a   :  { %697 = vrot.lane.b32.xlu0 %v2178_v30, %s2204_s29  ;;  %2181 = vrcp.f32 %v691_v32 }
0x2044   :  { %v2182_v35 = vpop.eup %2181 }
0x2045   :  { %v695_v39 = vmul.f32 %v2182_v35, %v2509_v29 }
0x20a8   :  { %v1393_v33 = vpop.permute.xlu0 %1392 }
0x20a9   :  { %v1395_v15 = vmul.f32 %v2174_v23, %v1393_v33  ;;  %v1629_v23 = vld [vmem:[%s2684_s7 + $0x10] sm:$0xff] }
0x20aa   :  { %v1633_v26 = vpack.c.bf16 %v1630_v50, %v1629_v23 }
0x20ab   :  { %v1436_v34 = vpack.c.bf16 %v1395_v15, %v1395_v15 }
0x20ac   :  { %v698_v49 = vpop.permute.xlu0 %697 }
0x20ad   :  { %v700_v10 = vmul.f32 %v2182_v35, %v698_v49  ;;  %1438 = vrot.lane.b32.xlu1 %v1436_v34, %s2205_s3 }
0x20af   :  { %702 = vrot.lane.b32.xlu0 %v700_v10, %s2205_s3 }
0x211f   :  { %v1439_v37 = vpop.permute.xlu1 %1438 }
0x2120   :  { %2001 = vmatmul.mubr.msk.bf16.vlgmr.msra.gmra.mrb[32].mxu0 %vm139_vm2, %v1439_v37 }
0x2121   :  { %v703_v41 = vpop.permute.xlu0 %702  ;;  %2024 = vmatprep.mubr.msk.bf16.mxu0 %vm2202_vm0, %v2201_v0  ;;  %2021 = vmatpush3.bf16.msra.mxu0 %v1632_v24 }
0x2122   :  { %v705_v11 = vadd.f32 %v703_v41, %v695_v39  ;;  %2022 = vmatprep.subr.bf16.mxu0 %v2201_v0 }
0x2124   :  { %2183 = vtanh.f32 %v705_v11 }
0x2125   :  { %2023 = vmatpush3.bf16.msra.mxu0 %v1633_v26 }
0x212e   :  { %v2184_v40 = vpop.eup %2183 }
0x212f   :  { %708 = vrot.lane.b32.xlu0 %v2184_v40, %s2204_s29 }
0x21a1   :  { %v709_v43 = vpop.permute.xlu0 %708 }
0x21a2   :  { %v711_v44 = vmul.f32 %v2182_v35, %v709_v43 }
0x21a4   :  { %v1508_v57 = vpack.c.bf16 %v711_v44, %v711_v44 }
0x21a6   :  { %1510 = vrot.lane.b32.xlu0 %v1508_v57, %s2205_s3 }
0x21f3   :  { %v1477_v45 = vpop.f32.mrb[32].mxu0 }
0x21f4   :  { %v2034_v47 = vadd.f32 %v2502_v61, %v1477_v45  ;;  %v2002_v48 = vpop.f32.mrb[33].mxu0 }
0x21f5   :  { %v1480_v21 = vpop.f32.mrb[34].mxu0 }
0x21f6   :  { %2185 = vtanh.f32 %v2034_v47  ;;  %v2003_v29 = vpop.f32.mrb[35].mxu0  ;;  %v1732_v54 = vmul.f32 -1.442695, %v2034_v47 }
0x21f8   :  { %2187 = vpow2.f32 %v1732_v54 }
0x2200   :  { %v2186_v51 = vpop.eup %2185 }
0x2201   :  { %1493 = vrot.lane.b32.xlu1 %v2186_v51, %s2204_s29 }
0x2202   :  { %v2188_v16 = vpop.eup %2187 }
0x2203   :  { %v1487_v17 = vadd.f32 1.0, %v2188_v16 }
0x2205   :  { %2189 = vrcp.f32 %v1487_v17 }
0x220f   :  { %v2190_v9 = vpop.eup %2189 }
0x2210   :  { %v1491_v56 = vmul.f32 %v2190_v9, %v1389_v28 }
0x2218   :  { %v1511_v53 = vpop.permute.xlu0 %1510 }
0x2219   :  { %2009 = vmatmul.mubr.msk.bf16.vlgmr.msra.gmra.mrb[32].mxu1 %vm139_vm2, %v1511_v53 }
0x221a   :  { %2013 = vmatpush3.bf16.msra.mxu1 %v2462_v52  ;;  %2016 = vmatprep.mubr.msk.bf16.mxu1 %vm2202_vm0, %v2201_v0 }
0x221b   :  { %2014 = vmatprep.subr.bf16.mxu1 %v2201_v0 }
0x221e   :  { %2015 = vmatpush3.bf16.msra.mxu1 %v2474_v55 }
0x2273   :  { %v1494_v42 = vpop.permute.xlu1 %1493 }
0x2274   :  { %v1496_v38 = vmul.f32 %v2190_v9, %v1494_v42 }
0x2276   :  { %1498 = vrot.lane.b32.xlu1 %v1496_v38, %s2205_s3 }
0x22e8   :  { %v1499_v58 = vpop.permute.xlu1 %1498 }
0x22e9   :  { %v1501_v52 = vadd.f32 %v1499_v58, %v1491_v56 }
0x22eb   :  { %2191 = vtanh.f32 %v1501_v52 }
0x22f5   :  { %v2192_v59 = vpop.eup %2191 }
0x22f6   :  { %1504 = vrot.lane.b32.xlu1 %v2192_v59, %s2204_s29 }
0x2368   :  { %v1505_v36 = vpop.permute.xlu1 %1504 }
0x2369   :  { %v1507_v60 = vmul.f32 %v2190_v9, %v1505_v36 }
0x236b   :  { %v1555_v55 = vpack.c.bf16 %v1507_v60, %v1507_v60 }
0x236d   :  { %1557 = vrot.lane.b32.xlu1 %v1555_v55, %s2205_s3 }
0x23df   :  { %v1558_v62 = vpop.permute.xlu1 %1557 }
0x23e0   :  { %2017 = vmatmul.mubr.msk.bf16.vlgmr.msra.gmra.mrb[32].mxu1 %vm139_vm2, %v1558_v62 }
0x24b3   :  { %v1596_v63 = vpop.f32.mrb[32].mxu1 }
0x24b4   :  { %v2035_v1 = vadd.f32 %v2502_v61, %v1596_v63  ;;  %v2018_v2 = vpop.f32.mrb[33].mxu1 }
0x24b5   :  { %v1599_v6 = vpop.f32.mrb[34].mxu1 }
0x24b6   :  { %2193 = vtanh.f32 %v2035_v1  ;;  %v2019_v3 = vpop.f32.mrb[35].mxu1  ;;  %v1735_v5 = vmul.f32 -1.442695, %v2035_v1 }
0x24b8   :  { %2195 = vpow2.f32 %v1735_v5 }
0x24c0   :  { %v2194_v4 = vpop.eup %2193 }
0x24c1   :  { %1612 = vrot.lane.b32.xlu0 %v2194_v4, %s2204_s29 }
0x24c2   :  { %v2196_v12 = vpop.eup %2195 }
0x24c3   :  { %v1606_v13 = vadd.f32 1.0, %v2196_v12 }
0x24c5   :  { %2197 = vrcp.f32 %v1606_v13 }
0x24cf   :  { %v2198_v25 = vpop.eup %2197 }
0x24d0   :  { %v1610_v19 = vmul.f32 %v2198_v25, %v1501_v52 }
0x2533   :  { %v1613_v7 = vpop.permute.xlu0 %1612 }
0x2534   :  { %v1615_v14 = vmul.f32 %v2198_v25, %v1613_v7 }
0x2536   :  { %1617 = vrot.lane.b32.xlu1 %v1615_v14, %s2205_s3 }
0x25a8   :  { %v1618_v46 = vpop.permute.xlu1 %1617 }
0x25a9   :  { %v1620_v61 = vadd.f32 %v1618_v46, %v1610_v19 }
0x25ab   :  { %2199 = vtanh.f32 %v1620_v61 }
0x25b5   :  { %v2200_v27 = vpop.eup %2199 }
0x25b6   :  { %1623 = vrot.lane.b32.xlu0 %v2200_v27, %s2204_s29 }
0x2628   :  { %v1624_v28 = vpop.permute.xlu0 %1623 }
0x2629   :  { %v1626_v18 = vmul.f32 %v2198_v25, %v1624_v28 }
0x262b   :  { %v1631_v30 = vpack.c.bf16 %v1626_v18, %v1626_v18 }
0x262d   :  { %1642 = vrot.lane.b32.xlu1 %v1631_v30, %s2205_s3 }
0x269f   :  { %v1643_v31 = vpop.permute.xlu1 %1642 }
0x26a0   :  { %2025 = vmatmul.mubr.msk.bf16.vlgmr.msra.gmra.mrb[36].mxu0 %vm139_vm2, %v1643_v31 }
0x2773   :  { %v1681_v32 = vpop.f32.mrb[36].mxu0 }
0x2774   :  { %v1682_v33 = vadd.f32 %v1736_v8, %v1681_v32  ;;  %v2026_v15 = vpop.f32.mrb[37].mxu0 }
0x2775   :  { %v1684_v0 = vpop.f32.mrb[38].mxu0 }
0x2776   :  { %1687 = vst [vmem:[%s2686_s9] sm:$0xff] %v1682_v33  ;;  %v2027_v34 = vpop.f32.mrb[39].mxu0 }

</bundles_post_ra>
